<compile_context>
chip_gen: v7x
topology: tpu7x:2x2x1
jax: 0.10.0
libtpu: 0.0.40
codegen_flags: <defaults>
</compile_context>

<pallas_src>
import functools
import math

import jax
import jax.numpy as jnp
from jax.experimental import pallas as pl
from jax.experimental.pallas import tpu as pltpu


# ----------------------------------------------------------------------------
# Small helpers
# ----------------------------------------------------------------------------
def _apply_act(y, name):
    if name == "relu":
        return jnp.maximum(y, 0.0)
    if name == "softplus":
        return jnp.logaddexp(y, 0.0)
    if name == "sigmoid":
        return jax.nn.sigmoid(y)
    return y  # identity


def _pick_tile_m(M, tile_m):
    # Block rows must be a multiple of 8 or equal to the full M extent.
    return M if M <= tile_m else tile_m


# ----------------------------------------------------------------------------
# Kernel 1: fused chain of linear layers (skip layers via split matmul)
# ----------------------------------------------------------------------------
def _chain_kernel(*refs, meta, has_z, compute_dtype):
    i = 0
    y_ref = refs[i]; i += 1
    z_ref = None
    if has_z:
        z_ref = refs[i]; i += 1
    params = []
    for has_wz, act in meta:
        w_y = refs[i]; i += 1
        w_z = None
        if has_wz:
            w_z = refs[i]; i += 1
        b = refs[i]; i += 1
        params.append((w_y, w_z, b, act))
    o_ref = refs[i]

    y = y_ref[0].astype(compute_dtype)                       # (TM, Din)
    zv = z_ref[0].astype(compute_dtype) if has_z else None   # (TM, Dskip)
    for w_y, w_z, b, act in params:
        acc = jnp.dot(y, w_y[...].astype(compute_dtype),
                      preferred_element_type=jnp.float32)
        if w_z is not None:
            acc = acc + jnp.dot(zv, w_z[...].astype(compute_dtype),
                                preferred_element_type=jnp.float32)
        acc = acc + b[...]
        y = _apply_act(acc, act).astype(compute_dtype)
    o_ref[0] = y.astype(o_ref.dtype)


def mlp_chain(y, z, layers, *, tile_m, compute_dtype):
    """Run consecutive layers fused in one pallas_call.

    y: (Vy, M, Din); z: (Vz, M, Dskip) with Vz in {1, Vy} (used only by skip layers).
    layers: list of (w_y, w_z_or_None, b, act).
    """
    Vy, M, Din = y.shape
    TM = _pick_tile_m(M, tile_m)
    meta = tuple((w_z is not None, act) for (_, w_z, _, act) in layers)
    has_z = any(w_z is not None for (_, w_z, _, _) in layers)
    Dout = layers[-1][0].shape[1]

    in_specs = [pl.BlockSpec((1, TM, Din), lambda v, m: (v, m, 0))]
    inputs = [y]
    if has_z:
        Vz, _, Dz = z.shape
        zmap = (lambda v, m: (0, m, 0)) if Vz == 1 else (lambda v, m: (v, m, 0))
        in_specs.append(pl.BlockSpec((1, TM, Dz), zmap))
        inputs.append(z)
    for w_y, w_z, b, _ in layers:
        in_specs.append(pl.BlockSpec(w_y.shape, lambda v, m: (0, 0)))
        inputs.append(w_y)
        if w_z is not None:
            in_specs.append(pl.BlockSpec(w_z.shape, lambda v, m: (0, 0)))
            inputs.append(w_z)
        in_specs.append(pl.BlockSpec(b.shape, lambda v, m: (0, 0)))
        inputs.append(b)

    return pl.pallas_call(
        functools.partial(_chain_kernel, meta=meta, has_z=has_z,
                          compute_dtype=compute_dtype),
        out_shape=jax.ShapeDtypeStruct((Vy, M, Dout), y.dtype),
        grid=(Vy, pl.cdiv(M, TM)),
        in_specs=in_specs,
        out_specs=pl.BlockSpec((1, TM, Dout), lambda v, m: (v, m, 0)),
        compiler_params=pltpu.CompilerParams(
            dimension_semantics=("parallel", "parallel")),
    )(*inputs)


# ----------------------------------------------------------------------------
# Kernel 2: fused imgfeat step + following main-MLP linear
#   f_new = softplus(f @ Wf + bf) ; y_new = act((y + f_new) @ W + b)
# ----------------------------------------------------------------------------
def _imgfeat_linear_kernel(f_ref, wf_ref, bf_ref, y_ref, w_ref, b_ref,
                           fout_ref, yout_ref, *, act, compute_dtype):
    f = f_ref[0].astype(compute_dtype)
    f_new = jnp.dot(f, wf_ref[...].astype(compute_dtype),
                    preferred_element_type=jnp.float32)
    f_new = jnp.logaddexp(f_new + bf_ref[...], 0.0)           # Softplus (f32)
    fout_ref[0] = f_new.astype(fout_ref.dtype)

    y_in = (y_ref[0].astype(jnp.float32) + f_new).astype(compute_dtype)
    out = jnp.dot(y_in, w_ref[...].astype(compute_dtype),
                  preferred_element_type=jnp.float32)
    out = out + b_ref[...]
    yout_ref[0] = _apply_act(out, act).astype(yout_ref.dtype)


def imgfeat_linear(f, wf, bf, y, w, b, act, *, tile_m, compute_dtype):
    V, M, Dfin = f.shape
    Dfout = wf.shape[1]
    Vy, _, Dy = y.shape
    Dout = w.shape[1]
    TM = _pick_tile_m(M, tile_m)
    y_map = (lambda v, m: (0, m, 0)) if Vy == 1 else (lambda v, m: (v, m, 0))
    return pl.pallas_call(
        functools.partial(_imgfeat_linear_kernel, act=act,
                          compute_dtype=compute_dtype),
        out_shape=(jax.ShapeDtypeStruct((V, M, Dfout), f.dtype),
                   jax.ShapeDtypeStruct((V, M, Dout), y.dtype)),
        grid=(V, pl.cdiv(M, TM)),
        in_specs=[pl.BlockSpec((1, TM, Dfin), lambda v, m: (v, m, 0)),
                  pl.BlockSpec(wf.shape, lambda v, m: (0, 0)),
                  pl.BlockSpec(bf.shape, lambda v, m: (0, 0)),
                  pl.BlockSpec((1, TM, Dy), y_map),
                  pl.BlockSpec(w.shape, lambda v, m: (0, 0)),
                  pl.BlockSpec(b.shape, lambda v, m: (0, 0))],
        out_specs=(pl.BlockSpec((1, TM, Dfout), lambda v, m: (v, m, 0)),
                   pl.BlockSpec((1, TM, Dout), lambda v, m: (v, m, 0))),
        compiler_params=pltpu.CompilerParams(
            dimension_semantics=("parallel", "parallel")),
    )(f, wf, bf, y, w, b)


# ----------------------------------------------------------------------------
# Kernel 3: fused mean over views + following linear
# ----------------------------------------------------------------------------
def _mean_linear_kernel(y_ref, w_ref, b_ref, o_ref, acc_ref, *, nv, act,
                        compute_dtype):
    v = pl.program_id(1)

    @pl.when(v == 0)
    def _():
        acc_ref[...] = jnp.zeros_like(acc_ref)

    acc_ref[...] += y_ref[0].astype(jnp.float32)

    @pl.when(v == nv - 1)
    def _():
        ym = (acc_ref[...] * (1.0 / nv)).astype(compute_dtype)
        out = jnp.dot(ym, w_ref[...].astype(compute_dtype),
                      preferred_element_type=jnp.float32)
        out = out + b_ref[...]
        o_ref[0] = _apply_act(out, act).astype(o_ref.dtype)


def mean_linear(y, w, b, act, *, tile_m, compute_dtype):
    V, M, D = y.shape
    Dout = w.shape[1]
    TM = _pick_tile_m(M, tile_m)
    return pl.pallas_call(
        functools.partial(_mean_linear_kernel, nv=V, act=act,
                          compute_dtype=compute_dtype),
        out_shape=jax.ShapeDtypeStruct((1, M, Dout), y.dtype),
        grid=(pl.cdiv(M, TM), V),                       # reduction axis (V) last
        in_specs=[pl.BlockSpec((1, TM, D), lambda m, v: (v, m, 0)),
                  pl.BlockSpec(w.shape, lambda m, v: (0, 0)),
                  pl.BlockSpec(b.shape, lambda m, v: (0, 0))],
        out_specs=pl.BlockSpec((1, TM, Dout), lambda m, v: (0, m, 0)),
        scratch_shapes=[pltpu.VMEM((TM, D), jnp.float32)],
        compiler_params=pltpu.CompilerParams(
            dimension_semantics=("parallel", "arbitrary")),
    )(y, w, b)


# ----------------------------------------------------------------------------
# Parameter init (deterministic, mirrors the PyTorch __init__)
# ----------------------------------------------------------------------------
def _xavier_uniform(key, fan_in, fan_out, dtype=jnp.float32):
    bound = math.sqrt(6.0 / (fan_in + fan_out))
    # stored as (Din, Dout) so kernels compute x @ W
    return jax.random.uniform(key, (fan_in, fan_out), dtype, -bound, bound)


def _default_bias(key, fan_in, fan_out, dtype=jnp.float32):
    bound = 1.0 / math.sqrt(fan_in)  # PyTorch Linear default bias init
    return jax.random.uniform(key, (1, fan_out), dtype, -bound, bound)


class MLPWithInputSkipsPallas:
    def __init__(self, key, n_layers=8, input_dim=39, output_dim=256,
                 skip_dim=39, hidden_dim=256, input_skips=(5,),
                 imgfeat_dim=16, last_layer_bias_init=None,
                 last_activation="relu", tile_m=1024,
                 compute_dtype=jnp.float32):
        # compute_dtype=jnp.bfloat16 enables bf16 MXU inputs (v6e/v7x); f32 accumulate.
        self.n_layers = n_layers
        self.input_dim = input_dim
        self.output_dim = output_dim
        self.skip_dim = skip_dim
        self.hidden_dim = hidden_dim
        self.input_skips = set(input_skips)
        self.n_imgfeat_layers = 3
        self.tile_m = tile_m
        self.compute_dtype = compute_dtype
        assert self.n_layers > self.n_imgfeat_layers + 1

        keys = jax.random.split(key, 2 * (self.n_imgfeat_layers + self.n_layers))
        kit = iter(keys)

        # imgfeat MLP (each layer is Linear + Softplus)
        self.imgfeat_params = []
        for i in range(self.n_imgfeat_layers):
            dimin = imgfeat_dim if i == 0 else hidden_dim
            dimout = hidden_dim
            if i > 0 and i in self.input_skips:
                dimin = hidden_dim + skip_dim
            if i + 1 in self.input_skips:
                dimout = hidden_dim + skip_dim
            w = _xavier_uniform(next(kit), dimin, dimout)
            b = _default_bias(next(kit), dimin, dimout)
            if i == self.n_imgfeat_layers - 1 and last_layer_bias_init is not None:
                b = jnp.full_like(b, last_layer_bias_init)
            self.imgfeat_params.append((w, b))

        # main MLP.  Faithful to the reference: non-last layers use
        # `last_activation` (relu by default), the LAST layer uses Softplus.
        self.mlp_params = []
        self.acts = []
        for li in range(self.n_layers):
            dimin = hidden_dim if li > 0 else input_dim
            dimout = hidden_dim if li + 1 < self.n_layers else output_dim
            if li > 0 and li in self.input_skips:
                dimin = hidden_dim + skip_dim
            w = _xavier_uniform(next(kit), dimin, dimout)
            b = _default_bias(next(kit), dimin, dimout)
            if li == self.n_layers - 1 and last_layer_bias_init is not None:
                b = jnp.full_like(b, last_layer_bias_init)
            self.mlp_params.append((w, b))
            self.acts.append(last_activation if li + 1 < self.n_layers else "softplus")

    def __call__(self, x, z=None, imgfeat=None):
        # x:       (1, B1, B2, B3, input_dim)
        # z:       (1, B1, B2, B3, skip_dim)  (defaults to x)
        # imgfeat: (V, B1, B2, B3, imgfeat_dim) or None
        if z is None:
            z = x
        batch = x.shape[1:-1]
        M = math.prod(batch)
        y = x.reshape(x.shape[0], M, x.shape[-1])
        z3 = z.reshape(z.shape[0], M, z.shape[-1])
        f = None
        if imgfeat is not None:
            f = imgfeat.reshape(imgfeat.shape[0], M, imgfeat.shape[-1])

        pending = []  # (w_y, w_z_or_None, b, act) for the current fused chain

        def flush(y_cur):
            nonlocal pending
            if pending:
                y_cur = mlp_chain(y_cur, z3, pending, tile_m=self.tile_m,
                                  compute_dtype=self.compute_dtype)
                pending = []
            return y_cur

        for li in range(self.n_layers):
            w, b = self.mlp_params[li]
            act = self.acts[li]
            is_skip = li in self.input_skips
            imgfeat_here = f is not None and 0 < li <= self.n_imgfeat_layers
            mean_here = f is not None and li == self.n_imgfeat_layers + 1

            if imgfeat_here or mean_here:
                y = flush(y)
                if is_skip:
                    # TODO(synk): rare config (skip coinciding with the imgfeat/mean
                    # layers) falls back to a wrapper-side concat instead of the
                    # in-kernel split matmul.
                    zb = jnp.broadcast_to(z3, y.shape[:-1] + (z3.shape[-1],))
                    y = jnp.concatenate([y, zb], axis=-1)
                if imgfeat_here:
                    wf, bf = self.imgfeat_params[li - 1]
                    f, y = imgfeat_linear(f, wf, bf, y, w, b, act,
                                          tile_m=self.tile_m,
                                          compute_dtype=self.compute_dtype)
                else:
                    y = mean_linear(y, w, b, act, tile_m=self.tile_m,
                                    compute_dtype=self.compute_dtype)
            else:
                if is_skip and li > 0:
                    split = w.shape[0] - self.skip_dim
                    pending.append((w[:split], w[split:], b, act))
                else:
                    pending.append((w, None, b, act))

        y = flush(y)
        return y.reshape((y.shape[0],) + batch + (y.shape[-1],))


# ----------------------------------------------------------------------------
# Pure-JAX reference (mirrors the PyTorch forward), used for validation only.
# ----------------------------------------------------------------------------
def reference_forward(model, x, z=None, imgfeat=None):
    if z is None:
        z = x
    acts = {"relu": jax.nn.relu, "softplus": jax.nn.softplus,
            "sigmoid": jax.nn.sigmoid, "identity": lambda t: t}
    y = x
    f = imgfeat
    hp = jax.lax.Precision.HIGHEST
    for li in range(model.n_layers):
        if li in model.input_skips:
            zb = jnp.broadcast_to(z, y.shape[:-1] + (z.shape[-1],))
            y = jnp.concatenate([y, zb], axis=-1)
        if f is not None:
            if 0 < li <= model.n_imgfeat_layers:
                wf, bf = model.imgfeat_params[li - 1]
                f = jax.nn.softplus(jnp.dot(f, wf, precision=hp) + bf)
                y = y + f
            elif li == model.n_imgfeat_layers + 1:
                y = jnp.mean(y, axis=0, keepdims=True)
        w, b = model.mlp_params[li]
        y = acts[model.acts[li]](jnp.dot(y, w, precision=hp) + b)
    return y


# ----------------------------------------------------------------------------
# Demo
# ----------------------------------------------------------------------------
if __name__ == "__main__":
    key = jax.random.PRNGKey(0)
    kp, kx, kz, kf = jax.random.split(key, 4)

    # Small, module-consistent shapes.
    N_LAYERS, IN_DIM, OUT_DIM, SKIP_DIM, HID_DIM = 8, 12, 8, 12, 32
    IMGFEAT_DIM = 16
    B1, B2, B3, V = 2, 4, 4, 3

    model = MLPWithInputSkipsPallas(
        kp, n_layers=N_LAYERS, input_dim=IN_DIM, output_dim=OUT_DIM,
        skip_dim=SKIP_DIM, hidden_dim=HID_DIM, input_skips=(5,),
        imgfeat_dim=IMGFEAT_DIM)

    x = jax.random.normal(kx, (1, B1, B2, B3, IN_DIM), jnp.float32)
    z = jax.random.normal(kz, (1, B1, B2, B3, SKIP_DIM), jnp.float32)
    imgfeat = jax.random.normal(kf, (V, B1, B2, B3, IMGFEAT_DIM), jnp.float32)

    # With imgfeat: exercises chain + fused imgfeat/linear + fused mean/linear.
    fwd = jax.jit(lambda a, b, c: model(a, b, c))
    y = fwd(x, z, imgfeat)
    jax.block_until_ready(y)
    assert y.shape == (1, B1, B2, B3, OUT_DIM), y.shape
    assert bool(jnp.all(jnp.isfinite(y)))
    y_ref = reference_forward(model, x, z, imgfeat)
    assert bool(jnp.allclose(y, y_ref, rtol=5e-2, atol=5e-2))

    # Without imgfeat: exercises the fully fused 8-layer chain with split-skip matmul.
    fwd2 = jax.jit(lambda a, b: model(a, b))
    y2 = fwd2(x, z)
    jax.block_until_ready(y2)
    assert y2.shape == (1, B1, B2, B3, OUT_DIM), y2.shape
    assert bool(jnp.all(jnp.isfinite(y2)))
    y2_ref = reference_forward(model, x, z, None)
    assert bool(jnp.allclose(y2, y2_ref, rtol=5e-2, atol=5e-2))

    print("KERNEL_OK")
</pallas_src>

<mosaic_0001>
module attributes {stable_mosaic.version = 11 : i64} {
  func.func @_imgfeat_linear_kernel(%arg0: i32, %arg1: i32, %arg2: memref<1x32x16xf32, #tpu.memory_space<vmem>>, %arg3: memref<16x32xf32, #tpu.memory_space<vmem>>, %arg4: memref<1x32xf32, #tpu.memory_space<vmem>>, %arg5: memref<1x32x32xf32, #tpu.memory_space<vmem>>, %arg6: memref<32x32xf32, #tpu.memory_space<vmem>>, %arg7: memref<1x32xf32, #tpu.memory_space<vmem>>, %arg8: memref<1x32x32xf32, #tpu.memory_space<vmem>>, %arg9: memref<1x32x32xf32, #tpu.memory_space<vmem>>) attributes {dimension_semantics = [#tpu.dimension_semantics<parallel>, #tpu.dimension_semantics<parallel>], iteration_bounds = array<i64: 3, 1>, scalar_prefetch = 0 : i64, scratch_operands = 0 : i64, tpu.core_type = #tpu.core_type<tc>, window_params = [{transform_indices = @transform_0, window_bounds = array<i64: 1, 32, 16>}, {pipeline_mode = #tpu.pipeline_mode<synchronous>, transform_indices = @transform_1, window_bounds = array<i64: 16, 32>}, {pipeline_mode = #tpu.pipeline_mode<synchronous>, transform_indices = @transform_2, window_bounds = array<i64: 1, 32>}, {transform_indices = @transform_3, window_bounds = array<i64: 1, 32, 32>}, {pipeline_mode = #tpu.pipeline_mode<synchronous>, transform_indices = @transform_4, window_bounds = array<i64: 32, 32>}, {pipeline_mode = #tpu.pipeline_mode<synchronous>, transform_indices = @transform_5, window_bounds = array<i64: 1, 32>}, {transform_indices = @transform_6, window_bounds = array<i64: 1, 32, 32>}, {transform_indices = @transform_7, window_bounds = array<i64: 1, 32, 32>}]} {
    %c0 = arith.constant 0 : index
    %c0_0 = arith.constant 0 : index
    %c0_1 = arith.constant 0 : index
    %0 = vector.load %arg2[%c0, %c0_0, %c0_1] : memref<1x32x16xf32, #tpu.memory_space<vmem>>, vector<1x32x16xf32>
    %1 = vector.shape_cast %0 : vector<1x32x16xf32> to vector<32x16xf32>
    %c0_2 = arith.constant 0 : index
    %c0_3 = arith.constant 0 : index
    %2 = vector.load %arg3[%c0_2, %c0_3] : memref<16x32xf32, #tpu.memory_space<vmem>>, vector<16x32xf32>
    %cst = arith.constant dense<0.000000e+00> : vector<32x32xf32>
    %3 = tpu.matmul %1, %2, %cst {dimension_numbers = #tpu.dot_dimension_numbers<[1], [0], [0], [1], [0, 0, 1, 1], [], []>} : vector<32x16xf32>, vector<16x32xf32>, vector<32x32xf32> -> vector<32x32xf32>
    %c0_4 = arith.constant 0 : index
    %c0_5 = arith.constant 0 : index
    %4 = vector.load %arg4[%c0_4, %c0_5] : memref<1x32xf32, #tpu.memory_space<vmem>>, vector<1x32xf32>
    %5 = vector.broadcast %4 : vector<1x32xf32> to vector<32x32xf32>
    %6 = arith.addf %3, %5 : vector<32x32xf32>
    %cst_6 = arith.constant 0.000000e+00 : f32
    %7 = vector.broadcast %cst_6 : f32 to vector<32x32xf32>
    %8 = arith.maximumf %6, %7 : vector<32x32xf32>
    %9 = vector.broadcast %cst_6 : f32 to vector<32x32xf32>
    %10 = arith.subf %6, %9 : vector<32x32xf32>
    %11 = arith.cmpf one, %10, %10 : vector<32x32xf32>
    %12 = vector.broadcast %cst_6 : f32 to vector<32x32xf32>
    %13 = arith.addf %6, %12 : vector<32x32xf32>
    %14 = math.absf %10 : vector<32x32xf32>
    %cst_7 = arith.constant 0.000000e+00 : f32
    %15 = vector.broadcast %cst_7 : f32 to vector<32x32xf32>
    %16 = arith.subf %15, %14 : vector<32x32xf32>
    %17 = math.exp %16 : vector<32x32xf32>
    %18 = math.log1p %17 : vector<32x32xf32>
    %19 = arith.addf %8, %18 : vector<32x32xf32>
    %20 = arith.select %11, %13, %19 : vector<32x32xi1>, vector<32x32xf32>
    %c0_8 = arith.constant 0 : index
    %c0_9 = arith.constant 0 : index
    %c0_10 = arith.constant 0 : index
    %21 = vector.load %arg8[%c0_8, %c0_9, %c0_10] : memref<1x32x32xf32, #tpu.memory_space<vmem>>, vector<1x32x32xf32>
    %22 = vector.shape_cast %21 : vector<1x32x32xf32> to vector<32x32xf32>
    %23 = vector.shape_cast %20 : vector<32x32xf32> to vector<1x32x32xf32>
    tpu.vector_store %arg8[%c0_8, %c0_9, %c0_10], %23 {strides = array<i32>} : memref<1x32x32xf32, #tpu.memory_space<vmem>>, vector<1x32x32xf32>,
    %c0_11 = arith.constant 0 : index
    %c0_12 = arith.constant 0 : index
    %c0_13 = arith.constant 0 : index
    %24 = vector.load %arg5[%c0_11, %c0_12, %c0_13] : memref<1x32x32xf32, #tpu.memory_space<vmem>>, vector<1x32x32xf32>
    %25 = vector.shape_cast %24 : vector<1x32x32xf32> to vector<32x32xf32>
    %26 = arith.addf %25, %20 : vector<32x32xf32>
    %c0_14 = arith.constant 0 : index
    %c0_15 = arith.constant 0 : index
    %27 = vector.load %arg6[%c0_14, %c0_15] : memref<32x32xf32, #tpu.memory_space<vmem>>, vector<32x32xf32>
    %cst_16 = arith.constant dense<0.000000e+00> : vector<32x32xf32>
    %28 = tpu.matmul %26, %27, %cst_16 {dimension_numbers = #tpu.dot_dimension_numbers<[1], [0], [0], [1], [0, 0, 1, 1], [], []>} : vector<32x32xf32>, vector<32x32xf32>, vector<32x32xf32> -> vector<32x32xf32>
    %c0_17 = arith.constant 0 : index
    %c0_18 = arith.constant 0 : index
    %29 = vector.load %arg7[%c0_17, %c0_18] : memref<1x32xf32, #tpu.memory_space<vmem>>, vector<1x32xf32>
    %30 = vector.broadcast %29 : vector<1x32xf32> to vector<32x32xf32>
    %31 = arith.addf %28, %30 : vector<32x32xf32>
    %cst_19 = arith.constant 0.000000e+00 : f32
    %32 = vector.broadcast %cst_19 : f32 to vector<32x32xf32>
    %33 = arith.maximumf %31, %32 : vector<32x32xf32>
    %c0_20 = arith.constant 0 : index
    %c0_21 = arith.constant 0 : index
    %c0_22 = arith.constant 0 : index
    %34 = vector.load %arg9[%c0_20, %c0_21, %c0_22] : memref<1x32x32xf32, #tpu.memory_space<vmem>>, vector<1x32x32xf32>
    %35 = vector.shape_cast %34 : vector<1x32x32xf32> to vector<32x32xf32>
    %36 = vector.shape_cast %33 : vector<32x32xf32> to vector<1x32x32xf32>
    tpu.vector_store %arg9[%c0_20, %c0_21, %c0_22], %36 {strides = array<i32>} : memref<1x32x32xf32, #tpu.memory_space<vmem>>, vector<1x32x32xf32>,
    return
  }
  func.func @transform_0(%arg0: i32, %arg1: i32) -> (i32, i32, i32) {
    %c0_i32 = arith.constant 0 : i32
    %c0_i32_0 = arith.constant 0 : i32
    return %arg0, %arg1, %c0_i32 : i32, i32, i32
  }
  func.func @transform_1(%arg0: i32, %arg1: i32) -> (i32, i32) {
    %c0_i32 = arith.constant 0 : i32
    %c0_i32_0 = arith.constant 0 : i32
    %c0_i32_1 = arith.constant 0 : i32
    return %c0_i32, %c0_i32_0 : i32, i32
  }
  func.func @transform_2(%arg0: i32, %arg1: i32) -> (i32, i32) {
    %c0_i32 = arith.constant 0 : i32
    %c0_i32_0 = arith.constant 0 : i32
    %c0_i32_1 = arith.constant 0 : i32
    return %c0_i32, %c0_i32_0 : i32, i32
  }
  func.func @transform_3(%arg0: i32, %arg1: i32) -> (i32, i32, i32) {
    %c0_i32 = arith.constant 0 : i32
    %c0_i32_0 = arith.constant 0 : i32
    %c0_i32_1 = arith.constant 0 : i32
    return %c0_i32, %arg1, %c0_i32_0 : i32, i32, i32
  }
  func.func @transform_4(%arg0: i32, %arg1: i32) -> (i32, i32) {
    %c0_i32 = arith.constant 0 : i32
    %c0_i32_0 = arith.constant 0 : i32
    %c0_i32_1 = arith.constant 0 : i32
    return %c0_i32, %c0_i32_0 : i32, i32
  }
  func.func @transform_5(%arg0: i32, %arg1: i32) -> (i32, i32) {
    %c0_i32 = arith.constant 0 : i32
    %c0_i32_0 = arith.constant 0 : i32
    %c0_i32_1 = arith.constant 0 : i32
    return %c0_i32, %c0_i32_0 : i32, i32
  }
  func.func @transform_6(%arg0: i32, %arg1: i32) -> (i32, i32, i32) {
    %c0_i32 = arith.constant 0 : i32
    %c0_i32_0 = arith.constant 0 : i32
    return %arg0, %arg1, %c0_i32 : i32, i32, i32
  }
  func.func @transform_7(%arg0: i32, %arg1: i32) -> (i32, i32, i32) {
    %c0_i32 = arith.constant 0 : i32
    %c0_i32_0 = arith.constant 0 : i32
    return %arg0, %arg1, %c0_i32 : i32, i32, i32
  }
}

module attributes {stable_mosaic.version = 11 : i64} {
  func.func @_imgfeat_linear_kernel(%arg0: i32, %arg1: i32, %arg2: memref<1x32x32xf32, #tpu.memory_space<vmem>>, %arg3: memref<32x32xf32, #tpu.memory_space<vmem>>, %arg4: memref<1x32xf32, #tpu.memory_space<vmem>>, %arg5: memref<1x32x32xf32, #tpu.memory_space<vmem>>, %arg6: memref<32x32xf32, #tpu.memory_space<vmem>>, %arg7: memref<1x32xf32, #tpu.memory_space<vmem>>, %arg8: memref<1x32x32xf32, #tpu.memory_space<vmem>>, %arg9: memref<1x32x32xf32, #tpu.memory_space<vmem>>) attributes {dimension_semantics = [#tpu.dimension_semantics<parallel>, #tpu.dimension_semantics<parallel>], iteration_bounds = array<i64: 3, 1>, scalar_prefetch = 0 : i64, scratch_operands = 0 : i64, tpu.core_type = #tpu.core_type<tc>, window_params = [{transform_indices = @transform_0, window_bounds = array<i64: 1, 32, 32>}, {pipeline_mode = #tpu.pipeline_mode<synchronous>, transform_indices = @transform_1, window_bounds = array<i64: 32, 32>}, {pipeline_mode = #tpu.pipeline_mode<synchronous>, transform_indices = @transform_2, window_bounds = array<i64: 1, 32>}, {transform_indices = @transform_3, window_bounds = array<i64: 1, 32, 32>}, {pipeline_mode = #tpu.pipeline_mode<synchronous>, transform_indices = @transform_4, window_bounds = array<i64: 32, 32>}, {pipeline_mode = #tpu.pipeline_mode<synchronous>, transform_indices = @transform_5, window_bounds = array<i64: 1, 32>}, {transform_indices = @transform_6, window_bounds = array<i64: 1, 32, 32>}, {transform_indices = @transform_7, window_bounds = array<i64: 1, 32, 32>}]} {
    %c0 = arith.constant 0 : index
    %c0_0 = arith.constant 0 : index
    %c0_1 = arith.constant 0 : index
    %0 = vector.load %arg2[%c0, %c0_0, %c0_1] : memref<1x32x32xf32, #tpu.memory_space<vmem>>, vector<1x32x32xf32>
    %1 = vector.shape_cast %0 : vector<1x32x32xf32> to vector<32x32xf32>
    %c0_2 = arith.constant 0 : index
    %c0_3 = arith.constant 0 : index
    %2 = vector.load %arg3[%c0_2, %c0_3] : memref<32x32xf32, #tpu.memory_space<vmem>>, vector<32x32xf32>
    %cst = arith.constant dense<0.000000e+00> : vector<32x32xf32>
    %3 = tpu.matmul %1, %2, %cst {dimension_numbers = #tpu.dot_dimension_numbers<[1], [0], [0], [1], [0, 0, 1, 1], [], []>} : vector<32x32xf32>, vector<32x32xf32>, vector<32x32xf32> -> vector<32x32xf32>
    %c0_4 = arith.constant 0 : index
    %c0_5 = arith.constant 0 : index
    %4 = vector.load %arg4[%c0_4, %c0_5] : memref<1x32xf32, #tpu.memory_space<vmem>>, vector<1x32xf32>
    %5 = vector.broadcast %4 : vector<1x32xf32> to vector<32x32xf32>
    %6 = arith.addf %3, %5 : vector<32x32xf32>
    %cst_6 = arith.constant 0.000000e+00 : f32
    %7 = vector.broadcast %cst_6 : f32 to vector<32x32xf32>
    %8 = arith.maximumf %6, %7 : vector<32x32xf32>
    %9 = vector.broadcast %cst_6 : f32 to vector<32x32xf32>
    %10 = arith.subf %6, %9 : vector<32x32xf32>
    %11 = arith.cmpf one, %10, %10 : vector<32x32xf32>
    %12 = vector.broadcast %cst_6 : f32 to vector<32x32xf32>
    %13 = arith.addf %6, %12 : vector<32x32xf32>
    %14 = math.absf %10 : vector<32x32xf32>
    %cst_7 = arith.constant 0.000000e+00 : f32
    %15 = vector.broadcast %cst_7 : f32 to vector<32x32xf32>
    %16 = arith.subf %15, %14 : vector<32x32xf32>
    %17 = math.exp %16 : vector<32x32xf32>
    %18 = math.log1p %17 : vector<32x32xf32>
    %19 = arith.addf %8, %18 : vector<32x32xf32>
    %20 = arith.select %11, %13, %19 : vector<32x32xi1>, vector<32x32xf32>
    %c0_8 = arith.constant 0 : index
    %c0_9 = arith.constant 0 : index
    %c0_10 = arith.constant 0 : index
    %21 = vector.load %arg8[%c0_8, %c0_9, %c0_10] : memref<1x32x32xf32, #tpu.memory_space<vmem>>, vector<1x32x32xf32>
    %22 = vector.shape_cast %21 : vector<1x32x32xf32> to vector<32x32xf32>
    %23 = vector.shape_cast %20 : vector<32x32xf32> to vector<1x32x32xf32>
    tpu.vector_store %arg8[%c0_8, %c0_9, %c0_10], %23 {strides = array<i32>} : memref<1x32x32xf32, #tpu.memory_space<vmem>>, vector<1x32x32xf32>,
    %c0_11 = arith.constant 0 : index
    %c0_12 = arith.constant 0 : index
    %c0_13 = arith.constant 0 : index
    %24 = vector.load %arg5[%c0_11, %c0_12, %c0_13] : memref<1x32x32xf32, #tpu.memory_space<vmem>>, vector<1x32x32xf32>
    %25 = vector.shape_cast %24 : vector<1x32x32xf32> to vector<32x32xf32>
    %26 = arith.addf %25, %20 : vector<32x32xf32>
    %c0_14 = arith.constant 0 : index
    %c0_15 = arith.constant 0 : index
    %27 = vector.load %arg6[%c0_14, %c0_15] : memref<32x32xf32, #tpu.memory_space<vmem>>, vector<32x32xf32>
    %cst_16 = arith.constant dense<0.000000e+00> : vector<32x32xf32>
    %28 = tpu.matmul %26, %27, %cst_16 {dimension_numbers = #tpu.dot_dimension_numbers<[1], [0], [0], [1], [0, 0, 1, 1], [], []>} : vector<32x32xf32>, vector<32x32xf32>, vector<32x32xf32> -> vector<32x32xf32>
    %c0_17 = arith.constant 0 : index
    %c0_18 = arith.constant 0 : index
    %29 = vector.load %arg7[%c0_17, %c0_18] : memref<1x32xf32, #tpu.memory_space<vmem>>, vector<1x32xf32>
    %30 = vector.broadcast %29 : vector<1x32xf32> to vector<32x32xf32>
    %31 = arith.addf %28, %30 : vector<32x32xf32>
    %cst_19 = arith.constant 0.000000e+00 : f32
    %32 = vector.broadcast %cst_19 : f32 to vector<32x32xf32>
    %33 = arith.maximumf %31, %32 : vector<32x32xf32>
    %c0_20 = arith.constant 0 : index
    %c0_21 = arith.constant 0 : index
    %c0_22 = arith.constant 0 : index
    %34 = vector.load %arg9[%c0_20, %c0_21, %c0_22] : memref<1x32x32xf32, #tpu.memory_space<vmem>>, vector<1x32x32xf32>
    %35 = vector.shape_cast %34 : vector<1x32x32xf32> to vector<32x32xf32>
    %36 = vector.shape_cast %33 : vector<32x32xf32> to vector<1x32x32xf32>
    tpu.vector_store %arg9[%c0_20, %c0_21, %c0_22], %36 {strides = array<i32>} : memref<1x32x32xf32, #tpu.memory_space<vmem>>, vector<1x32x32xf32>,
    return
  }
  func.func @transform_0(%arg0: i32, %arg1: i32) -> (i32, i32, i32) {
    %c0_i32 = arith.constant 0 : i32
    %c0_i32_0 = arith.constant 0 : i32
    return %arg0, %arg1, %c0_i32 : i32, i32, i32
  }
  func.func @transform_1(%arg0: i32, %arg1: i32) -> (i32, i32) {
    %c0_i32 = arith.constant 0 : i32
    %c0_i32_0 = arith.constant 0 : i32
    %c0_i32_1 = arith.constant 0 : i32
    return %c0_i32, %c0_i32_0 : i32, i32
  }
  func.func @transform_2(%arg0: i32, %arg1: i32) -> (i32, i32) {
    %c0_i32 = arith.constant 0 : i32
    %c0_i32_0 = arith.constant 0 : i32
    %c0_i32_1 = arith.constant 0 : i32
    return %c0_i32, %c0_i32_0 : i32, i32
  }
  func.func @transform_3(%arg0: i32, %arg1: i32) -> (i32, i32, i32) {
    %c0_i32 = arith.constant 0 : i32
    %c0_i32_0 = arith.constant 0 : i32
    return %arg0, %arg1, %c0_i32 : i32, i32, i32
  }
  func.func @transform_4(%arg0: i32, %arg1: i32) -> (i32, i32) {
    %c0_i32 = arith.constant 0 : i32
    %c0_i32_0 = arith.constant 0 : i32
    %c0_i32_1 = arith.constant 0 : i32
    return %c0_i32, %c0_i32_0 : i32, i32
  }
  func.func @transform_5(%arg0: i32, %arg1: i32) -> (i32, i32) {
    %c0_i32 = arith.constant 0 : i32
    %c0_i32_0 = arith.constant 0 : i32
    %c0_i32_1 = arith.constant 0 : i32
    return %c0_i32, %c0_i32_0 : i32, i32
  }
  func.func @transform_6(%arg0: i32, %arg1: i32) -> (i32, i32, i32) {
    %c0_i32 = arith.constant 0 : i32
    %c0_i32_0 = arith.constant 0 : i32
    return %arg0, %arg1, %c0_i32 : i32, i32, i32
  }
  func.func @transform_7(%arg0: i32, %arg1: i32) -> (i32, i32, i32) {
    %c0_i32 = arith.constant 0 : i32
    %c0_i32_0 = arith.constant 0 : i32
    return %arg0, %arg1, %c0_i32 : i32, i32, i32
  }
}

module attributes {stable_mosaic.version = 11 : i64} {
  func.func @_imgfeat_linear_kernel(%arg0: i32, %arg1: i32, %arg2: memref<1x32x32xf32, #tpu.memory_space<vmem>>, %arg3: memref<32x32xf32, #tpu.memory_space<vmem>>, %arg4: memref<1x32xf32, #tpu.memory_space<vmem>>, %arg5: memref<1x32x32xf32, #tpu.memory_space<vmem>>, %arg6: memref<32x32xf32, #tpu.memory_space<vmem>>, %arg7: memref<1x32xf32, #tpu.memory_space<vmem>>, %arg8: memref<1x32x32xf32, #tpu.memory_space<vmem>>, %arg9: memref<1x32x32xf32, #tpu.memory_space<vmem>>) attributes {dimension_semantics = [#tpu.dimension_semantics<parallel>, #tpu.dimension_semantics<parallel>], iteration_bounds = array<i64: 3, 1>, scalar_prefetch = 0 : i64, scratch_operands = 0 : i64, tpu.core_type = #tpu.core_type<tc>, window_params = [{transform_indices = @transform_0, window_bounds = array<i64: 1, 32, 32>}, {pipeline_mode = #tpu.pipeline_mode<synchronous>, transform_indices = @transform_1, window_bounds = array<i64: 32, 32>}, {pipeline_mode = #tpu.pipeline_mode<synchronous>, transform_indices = @transform_2, window_bounds = array<i64: 1, 32>}, {transform_indices = @transform_3, window_bounds = array<i64: 1, 32, 32>}, {pipeline_mode = #tpu.pipeline_mode<synchronous>, transform_indices = @transform_4, window_bounds = array<i64: 32, 32>}, {pipeline_mode = #tpu.pipeline_mode<synchronous>, transform_indices = @transform_5, window_bounds = array<i64: 1, 32>}, {transform_indices = @transform_6, window_bounds = array<i64: 1, 32, 32>}, {transform_indices = @transform_7, window_bounds = array<i64: 1, 32, 32>}]} {
    %c0 = arith.constant 0 : index
    %c0_0 = arith.constant 0 : index
    %c0_1 = arith.constant 0 : index
    %0 = vector.load %arg2[%c0, %c0_0, %c0_1] : memref<1x32x32xf32, #tpu.memory_space<vmem>>, vector<1x32x32xf32>
    %1 = vector.shape_cast %0 : vector<1x32x32xf32> to vector<32x32xf32>
    %c0_2 = arith.constant 0 : index
    %c0_3 = arith.constant 0 : index
    %2 = vector.load %arg3[%c0_2, %c0_3] : memref<32x32xf32, #tpu.memory_space<vmem>>, vector<32x32xf32>
    %cst = arith.constant dense<0.000000e+00> : vector<32x32xf32>
    %3 = tpu.matmul %1, %2, %cst {dimension_numbers = #tpu.dot_dimension_numbers<[1], [0], [0], [1], [0, 0, 1, 1], [], []>} : vector<32x32xf32>, vector<32x32xf32>, vector<32x32xf32> -> vector<32x32xf32>
    %c0_4 = arith.constant 0 : index
    %c0_5 = arith.constant 0 : index
    %4 = vector.load %arg4[%c0_4, %c0_5] : memref<1x32xf32, #tpu.memory_space<vmem>>, vector<1x32xf32>
    %5 = vector.broadcast %4 : vector<1x32xf32> to vector<32x32xf32>
    %6 = arith.addf %3, %5 : vector<32x32xf32>
    %cst_6 = arith.constant 0.000000e+00 : f32
    %7 = vector.broadcast %cst_6 : f32 to vector<32x32xf32>
    %8 = arith.maximumf %6, %7 : vector<32x32xf32>
    %9 = vector.broadcast %cst_6 : f32 to vector<32x32xf32>
    %10 = arith.subf %6, %9 : vector<32x32xf32>
    %11 = arith.cmpf one, %10, %10 : vector<32x32xf32>
    %12 = vector.broadcast %cst_6 : f32 to vector<32x32xf32>
    %13 = arith.addf %6, %12 : vector<32x32xf32>
    %14 = math.absf %10 : vector<32x32xf32>
    %cst_7 = arith.constant 0.000000e+00 : f32
    %15 = vector.broadcast %cst_7 : f32 to vector<32x32xf32>
    %16 = arith.subf %15, %14 : vector<32x32xf32>
    %17 = math.exp %16 : vector<32x32xf32>
    %18 = math.log1p %17 : vector<32x32xf32>
    %19 = arith.addf %8, %18 : vector<32x32xf32>
    %20 = arith.select %11, %13, %19 : vector<32x32xi1>, vector<32x32xf32>
    %c0_8 = arith.constant 0 : index
    %c0_9 = arith.constant 0 : index
    %c0_10 = arith.constant 0 : index
    %21 = vector.load %arg8[%c0_8, %c0_9, %c0_10] : memref<1x32x32xf32, #tpu.memory_space<vmem>>, vector<1x32x32xf32>
    %22 = vector.shape_cast %21 : vector<1x32x32xf32> to vector<32x32xf32>
    %23 = vector.shape_cast %20 : vector<32x32xf32> to vector<1x32x32xf32>
    tpu.vector_store %arg8[%c0_8, %c0_9, %c0_10], %23 {strides = array<i32>} : memref<1x32x32xf32, #tpu.memory_space<vmem>>, vector<1x32x32xf32>,
    %c0_11 = arith.constant 0 : index
    %c0_12 = arith.constant 0 : index
    %c0_13 = arith.constant 0 : index
    %24 = vector.load %arg5[%c0_11, %c0_12, %c0_13] : memref<1x32x32xf32, #tpu.memory_space<vmem>>, vector<1x32x32xf32>
    %25 = vector.shape_cast %24 : vector<1x32x32xf32> to vector<32x32xf32>
    %26 = arith.addf %25, %20 : vector<32x32xf32>
    %c0_14 = arith.constant 0 : index
    %c0_15 = arith.constant 0 : index
    %27 = vector.load %arg6[%c0_14, %c0_15] : memref<32x32xf32, #tpu.memory_space<vmem>>, vector<32x32xf32>
    %cst_16 = arith.constant dense<0.000000e+00> : vector<32x32xf32>
    %28 = tpu.matmul %26, %27, %cst_16 {dimension_numbers = #tpu.dot_dimension_numbers<[1], [0], [0], [1], [0, 0, 1, 1], [], []>} : vector<32x32xf32>, vector<32x32xf32>, vector<32x32xf32> -> vector<32x32xf32>
    %c0_17 = arith.constant 0 : index
    %c0_18 = arith.constant 0 : index
    %29 = vector.load %arg7[%c0_17, %c0_18] : memref<1x32xf32, #tpu.memory_space<vmem>>, vector<1x32xf32>
    %30 = vector.broadcast %29 : vector<1x32xf32> to vector<32x32xf32>
    %31 = arith.addf %28, %30 : vector<32x32xf32>
    %cst_19 = arith.constant 0.000000e+00 : f32
    %32 = vector.broadcast %cst_19 : f32 to vector<32x32xf32>
    %33 = arith.maximumf %31, %32 : vector<32x32xf32>
    %c0_20 = arith.constant 0 : index
    %c0_21 = arith.constant 0 : index
    %c0_22 = arith.constant 0 : index
    %34 = vector.load %arg9[%c0_20, %c0_21, %c0_22] : memref<1x32x32xf32, #tpu.memory_space<vmem>>, vector<1x32x32xf32>
    %35 = vector.shape_cast %34 : vector<1x32x32xf32> to vector<32x32xf32>
    %36 = vector.shape_cast %33 : vector<32x32xf32> to vector<1x32x32xf32>
    tpu.vector_store %arg9[%c0_20, %c0_21, %c0_22], %36 {strides = array<i32>} : memref<1x32x32xf32, #tpu.memory_space<vmem>>, vector<1x32x32xf32>,
    return
  }
  func.func @transform_0(%arg0: i32, %arg1: i32) -> (i32, i32, i32) {
    %c0_i32 = arith.constant 0 : i32
    %c0_i32_0 = arith.constant 0 : i32
    return %arg0, %arg1, %c0_i32 : i32, i32, i32
  }
  func.func @transform_1(%arg0: i32, %arg1: i32) -> (i32, i32) {
    %c0_i32 = arith.constant 0 : i32
    %c0_i32_0 = arith.constant 0 : i32
    %c0_i32_1 = arith.constant 0 : i32
    return %c0_i32, %c0_i32_0 : i32, i32
  }
  func.func @transform_2(%arg0: i32, %arg1: i32) -> (i32, i32) {
    %c0_i32 = arith.constant 0 : i32
    %c0_i32_0 = arith.constant 0 : i32
    %c0_i32_1 = arith.constant 0 : i32
    return %c0_i32, %c0_i32_0 : i32, i32
  }
  func.func @transform_3(%arg0: i32, %arg1: i32) -> (i32, i32, i32) {
    %c0_i32 = arith.constant 0 : i32
    %c0_i32_0 = arith.constant 0 : i32
    return %arg0, %arg1, %c0_i32 : i32, i32, i32
  }
  func.func @transform_4(%arg0: i32, %arg1: i32) -> (i32, i32) {
    %c0_i32 = arith.constant 0 : i32
    %c0_i32_0 = arith.constant 0 : i32
    %c0_i32_1 = arith.constant 0 : i32
    return %c0_i32, %c0_i32_0 : i32, i32
  }
  func.func @transform_5(%arg0: i32, %arg1: i32) -> (i32, i32) {
    %c0_i32 = arith.constant 0 : i32
    %c0_i32_0 = arith.constant 0 : i32
    %c0_i32_1 = arith.constant 0 : i32
    return %c0_i32, %c0_i32_0 : i32, i32
  }
  func.func @transform_6(%arg0: i32, %arg1: i32) -> (i32, i32, i32) {
    %c0_i32 = arith.constant 0 : i32
    %c0_i32_0 = arith.constant 0 : i32
    return %arg0, %arg1, %c0_i32 : i32, i32, i32
  }
  func.func @transform_7(%arg0: i32, %arg1: i32) -> (i32, i32, i32) {
    %c0_i32 = arith.constant 0 : i32
    %c0_i32_0 = arith.constant 0 : i32
    return %arg0, %arg1, %c0_i32 : i32, i32, i32
  }
}

module attributes {stable_mosaic.version = 11 : i64} {
  func.func @_chain_kernel(%arg0: i32, %arg1: i32, %arg2: memref<1x32x12xf32, #tpu.memory_space<vmem>>, %arg3: memref<12x32xf32, #tpu.memory_space<vmem>>, %arg4: memref<1x32xf32, #tpu.memory_space<vmem>>, %arg5: memref<1x32x32xf32, #tpu.memory_space<vmem>>) attributes {dimension_semantics = [#tpu.dimension_semantics<parallel>, #tpu.dimension_semantics<parallel>], iteration_bounds = array<i64: 1, 1>, scalar_prefetch = 0 : i64, scratch_operands = 0 : i64, tpu.core_type = #tpu.core_type<tc>, window_params = [{transform_indices = @transform_0, window_bounds = array<i64: 1, 32, 12>}, {pipeline_mode = #tpu.pipeline_mode<synchronous>, transform_indices = @transform_1, window_bounds = array<i64: 12, 32>}, {pipeline_mode = #tpu.pipeline_mode<synchronous>, transform_indices = @transform_2, window_bounds = array<i64: 1, 32>}, {transform_indices = @transform_3, window_bounds = array<i64: 1, 32, 32>}]} {
    %c0 = arith.constant 0 : index
    %c0_0 = arith.constant 0 : index
    %c0_1 = arith.constant 0 : index
    %0 = vector.load %arg2[%c0, %c0_0, %c0_1] : memref<1x32x12xf32, #tpu.memory_space<vmem>>, vector<1x32x12xf32>
    %1 = vector.shape_cast %0 : vector<1x32x12xf32> to vector<32x12xf32>
    %c0_2 = arith.constant 0 : index
    %c0_3 = arith.constant 0 : index
    %2 = vector.load %arg3[%c0_2, %c0_3] : memref<12x32xf32, #tpu.memory_space<vmem>>, vector<12x32xf32>
    %cst = arith.constant dense<0.000000e+00> : vector<32x32xf32>
    %3 = tpu.matmul %1, %2, %cst {dimension_numbers = #tpu.dot_dimension_numbers<[1], [0], [0], [1], [0, 0, 1, 1], [], []>} : vector<32x12xf32>, vector<12x32xf32>, vector<32x32xf32> -> vector<32x32xf32>
    %c0_4 = arith.constant 0 : index
    %c0_5 = arith.constant 0 : index
    %4 = vector.load %arg4[%c0_4, %c0_5] : memref<1x32xf32, #tpu.memory_space<vmem>>, vector<1x32xf32>
    %5 = vector.broadcast %4 : vector<1x32xf32> to vector<32x32xf32>
    %6 = arith.addf %3, %5 : vector<32x32xf32>
    %cst_6 = arith.constant 0.000000e+00 : f32
    %7 = vector.broadcast %cst_6 : f32 to vector<32x32xf32>
    %8 = arith.maximumf %6, %7 : vector<32x32xf32>
    %c0_7 = arith.constant 0 : index
    %c0_8 = arith.constant 0 : index
    %c0_9 = arith.constant 0 : index
    %9 = vector.load %arg5[%c0_7, %c0_8, %c0_9] : memref<1x32x32xf32, #tpu.memory_space<vmem>>, vector<1x32x32xf32>
    %10 = vector.shape_cast %9 : vector<1x32x32xf32> to vector<32x32xf32>
    %11 = vector.shape_cast %8 : vector<32x32xf32> to vector<1x32x32xf32>
    tpu.vector_store %arg5[%c0_7, %c0_8, %c0_9], %11 {strides = array<i32>} : memref<1x32x32xf32, #tpu.memory_space<vmem>>, vector<1x32x32xf32>,
    return
  }
  func.func @transform_0(%arg0: i32, %arg1: i32) -> (i32, i32, i32) {
    %c0_i32 = arith.constant 0 : i32
    %c0_i32_0 = arith.constant 0 : i32
    return %arg0, %arg1, %c0_i32 : i32, i32, i32
  }
  func.func @transform_1(%arg0: i32, %arg1: i32) -> (i32, i32) {
    %c0_i32 = arith.constant 0 : i32
    %c0_i32_0 = arith.constant 0 : i32
    %c0_i32_1 = arith.constant 0 : i32
    return %c0_i32, %c0_i32_0 : i32, i32
  }
  func.func @transform_2(%arg0: i32, %arg1: i32) -> (i32, i32) {
    %c0_i32 = arith.constant 0 : i32
    %c0_i32_0 = arith.constant 0 : i32
    %c0_i32_1 = arith.constant 0 : i32
    return %c0_i32, %c0_i32_0 : i32, i32
  }
  func.func @transform_3(%arg0: i32, %arg1: i32) -> (i32, i32, i32) {
    %c0_i32 = arith.constant 0 : i32
    %c0_i32_0 = arith.constant 0 : i32
    return %arg0, %arg1, %c0_i32 : i32, i32, i32
  }
}

module attributes {stable_mosaic.version = 11 : i64} {
  func.func @_mean_linear_kernel(%arg0: i32, %arg1: i32, %arg2: memref<1x32x32xf32, #tpu.memory_space<vmem>>, %arg3: memref<32x32xf32, #tpu.memory_space<vmem>>, %arg4: memref<1x32xf32, #tpu.memory_space<vmem>>, %arg5: memref<1x32x32xf32, #tpu.memory_space<vmem>>, %arg6: memref<32x32xf32, #tpu.memory_space<vmem>>) attributes {dimension_semantics = [#tpu.dimension_semantics<parallel>, #tpu.dimension_semantics<arbitrary>], iteration_bounds = array<i64: 1, 3>, scalar_prefetch = 0 : i64, scratch_operands = 1 : i64, tpu.core_type = #tpu.core_type<tc>, window_params = [{transform_indices = @transform_0, window_bounds = array<i64: 1, 32, 32>}, {pipeline_mode = #tpu.pipeline_mode<synchronous>, transform_indices = @transform_1, window_bounds = array<i64: 32, 32>}, {pipeline_mode = #tpu.pipeline_mode<synchronous>, transform_indices = @transform_2, window_bounds = array<i64: 1, 32>}, {transform_indices = @transform_3, window_bounds = array<i64: 1, 32, 32>}]} {
    %c0_i32 = arith.constant 0 : i32
    %0 = arith.cmpi eq, %arg1, %c0_i32 : i32
    %1 = arith.extui %0 : i1 to i32
    %c0_i32_0 = arith.constant 0 : i32
    %2 = arith.cmpi ne, %1, %c0_i32_0 : i32
    scf.if %2 {
      %cst = arith.constant 0.000000e+00 : f32
      %11 = vector.broadcast %cst : f32 to vector<32x32xf32>
      %c0_8 = arith.constant 0 : index
      %c0_9 = arith.constant 0 : index
      %12 = vector.load %arg6[%c0_8, %c0_9] : memref<32x32xf32, #tpu.memory_space<vmem>>, vector<32x32xf32>
      tpu.vector_store %arg6[%c0_8, %c0_9], %11 {strides = array<i32>} : memref<32x32xf32, #tpu.memory_space<vmem>>, vector<32x32xf32>,
    } else {
    }
    %c0 = arith.constant 0 : index
    %c0_1 = arith.constant 0 : index
    %3 = vector.load %arg6[%c0, %c0_1] : memref<32x32xf32, #tpu.memory_space<vmem>>, vector<32x32xf32>
    %c0_2 = arith.constant 0 : index
    %c0_3 = arith.constant 0 : index
    %c0_4 = arith.constant 0 : index
    %4 = vector.load %arg2[%c0_2, %c0_3, %c0_4] : memref<1x32x32xf32, #tpu.memory_space<vmem>>, vector<1x32x32xf32>
    %5 = vector.shape_cast %4 : vector<1x32x32xf32> to vector<32x32xf32>
    %6 = arith.addf %3, %5 : vector<32x32xf32>
    %c0_5 = arith.constant 0 : index
    %c0_6 = arith.constant 0 : index
    %7 = vector.load %arg6[%c0_5, %c0_6] : memref<32x32xf32, #tpu.memory_space<vmem>>, vector<32x32xf32>
    tpu.vector_store %arg6[%c0_5, %c0_6], %6 {strides = array<i32>} : memref<32x32xf32, #tpu.memory_space<vmem>>, vector<32x32xf32>,
    %c2_i32 = arith.constant 2 : i32
    %8 = arith.cmpi eq, %arg1, %c2_i32 : i32
    %9 = arith.extui %8 : i1 to i32
    %c0_i32_7 = arith.constant 0 : i32
    %10 = arith.cmpi ne, %9, %c0_i32_7 : i32
    scf.if %10 {
      %c0_8 = arith.constant 0 : index
      %c0_9 = arith.constant 0 : index
      %11 = vector.load %arg6[%c0_8, %c0_9] : memref<32x32xf32, #tpu.memory_space<vmem>>, vector<32x32xf32>
      %cst = arith.constant 0.333333343 : f32
      %12 = vector.broadcast %cst : f32 to vector<32x32xf32>
      %13 = arith.mulf %11, %12 : vector<32x32xf32>
      %c0_10 = arith.constant 0 : index
      %c0_11 = arith.constant 0 : index
      %14 = vector.load %arg3[%c0_10, %c0_11] : memref<32x32xf32, #tpu.memory_space<vmem>>, vector<32x32xf32>
      %cst_12 = arith.constant dense<0.000000e+00> : vector<32x32xf32>
      %15 = tpu.matmul %13, %14, %cst_12 {dimension_numbers = #tpu.dot_dimension_numbers<[1], [0], [0], [1], [0, 0, 1, 1], [], []>} : vector<32x32xf32>, vector<32x32xf32>, vector<32x32xf32> -> vector<32x32xf32>
      %c0_13 = arith.constant 0 : index
      %c0_14 = arith.constant 0 : index
      %16 = vector.load %arg4[%c0_13, %c0_14] : memref<1x32xf32, #tpu.memory_space<vmem>>, vector<1x32xf32>
      %17 = vector.broadcast %16 : vector<1x32xf32> to vector<32x32xf32>
      %18 = arith.addf %15, %17 : vector<32x32xf32>
      %cst_15 = arith.constant 0.000000e+00 : f32
      %19 = vector.broadcast %cst_15 : f32 to vector<32x32xf32>
      %20 = arith.maximumf %18, %19 : vector<32x32xf32>
      %c0_16 = arith.constant 0 : index
      %c0_17 = arith.constant 0 : index
      %c0_18 = arith.constant 0 : index
      %21 = vector.load %arg5[%c0_16, %c0_17, %c0_18] : memref<1x32x32xf32, #tpu.memory_space<vmem>>, vector<1x32x32xf32>
      %22 = vector.shape_cast %21 : vector<1x32x32xf32> to vector<32x32xf32>
      %23 = vector.shape_cast %20 : vector<32x32xf32> to vector<1x32x32xf32>
      tpu.vector_store %arg5[%c0_16, %c0_17, %c0_18], %23 {strides = array<i32>} : memref<1x32x32xf32, #tpu.memory_space<vmem>>, vector<1x32x32xf32>,
    } else {
    }
    return
  }
  func.func @transform_0(%arg0: i32, %arg1: i32) -> (i32, i32, i32) {
    %c0_i32 = arith.constant 0 : i32
    %c0_i32_0 = arith.constant 0 : i32
    return %arg1, %arg0, %c0_i32 : i32, i32, i32
  }
  func.func @transform_1(%arg0: i32, %arg1: i32) -> (i32, i32) {
    %c0_i32 = arith.constant 0 : i32
    %c0_i32_0 = arith.constant 0 : i32
    %c0_i32_1 = arith.constant 0 : i32
    return %c0_i32, %c0_i32_0 : i32, i32
  }
  func.func @transform_2(%arg0: i32, %arg1: i32) -> (i32, i32) {
    %c0_i32 = arith.constant 0 : i32
    %c0_i32_0 = arith.constant 0 : i32
    %c0_i32_1 = arith.constant 0 : i32
    return %c0_i32, %c0_i32_0 : i32, i32
  }
  func.func @transform_3(%arg0: i32, %arg1: i32) -> (i32, i32, i32) {
    %c0_i32 = arith.constant 0 : i32
    %c0_i32_0 = arith.constant 0 : i32
    %c0_i32_1 = arith.constant 0 : i32
    return %c0_i32, %arg0, %c0_i32_0 : i32, i32, i32
  }
}

module attributes {stable_mosaic.version = 11 : i64} {
  func.func @_chain_kernel(%arg0: i32, %arg1: i32, %arg2: memref<1x32x32xf32, #tpu.memory_space<vmem>>, %arg3: memref<1x32x12xf32, #tpu.memory_space<vmem>>, %arg4: memref<32x32xf32, #tpu.memory_space<vmem>>, %arg5: memref<12x32xf32, #tpu.memory_space<vmem>>, %arg6: memref<1x32xf32, #tpu.memory_space<vmem>>, %arg7: memref<32x32xf32, #tpu.memory_space<vmem>>, %arg8: memref<1x32xf32, #tpu.memory_space<vmem>>, %arg9: memref<32x8xf32, #tpu.memory_space<vmem>>, %arg10: memref<1x8xf32, #tpu.memory_space<vmem>>, %arg11: memref<1x32x8xf32, #tpu.memory_space<vmem>>) attributes {dimension_semantics = [#tpu.dimension_semantics<parallel>, #tpu.dimension_semantics<parallel>], iteration_bounds = array<i64: 1, 1>, scalar_prefetch = 0 : i64, scratch_operands = 0 : i64, tpu.core_type = #tpu.core_type<tc>, window_params = [{transform_indices = @transform_0, window_bounds = array<i64: 1, 32, 32>}, {transform_indices = @transform_1, window_bounds = array<i64: 1, 32, 12>}, {pipeline_mode = #tpu.pipeline_mode<synchronous>, transform_indices = @transform_2, window_bounds = array<i64: 32, 32>}, {pipeline_mode = #tpu.pipeline_mode<synchronous>, transform_indices = @transform_3, window_bounds = array<i64: 12, 32>}, {pipeline_mode = #tpu.pipeline_mode<synchronous>, transform_indices = @transform_4, window_bounds = array<i64: 1, 32>}, {pipeline_mode = #tpu.pipeline_mode<synchronous>, transform_indices = @transform_5, window_bounds = array<i64: 32, 32>}, {pipeline_mode = #tpu.pipeline_mode<synchronous>, transform_indices = @transform_6, window_bounds = array<i64: 1, 32>}, {pipeline_mode = #tpu.pipeline_mode<synchronous>, transform_indices = @transform_7, window_bounds = array<i64: 32, 8>}, {pipeline_mode = #tpu.pipeline_mode<synchronous>, transform_indices = @transform_8, window_bounds = array<i64: 1, 8>}, {transform_indices = @transform_9, window_bounds = array<i64: 1, 32, 8>}]} {
    %c0 = arith.constant 0 : index
    %c0_0 = arith.constant 0 : index
    %c0_1 = arith.constant 0 : index
    %0 = vector.load %arg2[%c0, %c0_0, %c0_1] : memref<1x32x32xf32, #tpu.memory_space<vmem>>, vector<1x32x32xf32>
    %1 = vector.shape_cast %0 : vector<1x32x32xf32> to vector<32x32xf32>
    %c0_2 = arith.constant 0 : index
    %c0_3 = arith.constant 0 : index
    %c0_4 = arith.constant 0 : index
    %2 = vector.load %arg3[%c0_2, %c0_3, %c0_4] : memref<1x32x12xf32, #tpu.memory_space<vmem>>, vector<1x32x12xf32>
    %3 = vector.shape_cast %2 : vector<1x32x12xf32> to vector<32x12xf32>
    %c0_5 = arith.constant 0 : index
    %c0_6 = arith.constant 0 : index
    %4 = vector.load %arg4[%c0_5, %c0_6] : memref<32x32xf32, #tpu.memory_space<vmem>>, vector<32x32xf32>
    %cst = arith.constant dense<0.000000e+00> : vector<32x32xf32>
    %5 = tpu.matmul %1, %4, %cst {dimension_numbers = #tpu.dot_dimension_numbers<[1], [0], [0], [1], [0, 0, 1, 1], [], []>} : vector<32x32xf32>, vector<32x32xf32>, vector<32x32xf32> -> vector<32x32xf32>
    %c0_7 = arith.constant 0 : index
    %c0_8 = arith.constant 0 : index
    %6 = vector.load %arg5[%c0_7, %c0_8] : memref<12x32xf32, #tpu.memory_space<vmem>>, vector<12x32xf32>
    %cst_9 = arith.constant dense<0.000000e+00> : vector<32x32xf32>
    %7 = tpu.matmul %3, %6, %cst_9 {dimension_numbers = #tpu.dot_dimension_numbers<[1], [0], [0], [1], [0, 0, 1, 1], [], []>} : vector<32x12xf32>, vector<12x32xf32>, vector<32x32xf32> -> vector<32x32xf32>
    %8 = arith.addf %5, %7 : vector<32x32xf32>
    %c0_10 = arith.constant 0 : index
    %c0_11 = arith.constant 0 : index
    %9 = vector.load %arg6[%c0_10, %c0_11] : memref<1x32xf32, #tpu.memory_space<vmem>>, vector<1x32xf32>
    %10 = vector.broadcast %9 : vector<1x32xf32> to vector<32x32xf32>
    %11 = arith.addf %8, %10 : vector<32x32xf32>
    %cst_12 = arith.constant 0.000000e+00 : f32
    %12 = vector.broadcast %cst_12 : f32 to vector<32x32xf32>
    %13 = arith.maximumf %11, %12 : vector<32x32xf32>
    %c0_13 = arith.constant 0 : index
    %c0_14 = arith.constant 0 : index
    %14 = vector.load %arg7[%c0_13, %c0_14] : memref<32x32xf32, #tpu.memory_space<vmem>>, vector<32x32xf32>
    %cst_15 = arith.constant dense<0.000000e+00> : vector<32x32xf32>
    %15 = tpu.matmul %13, %14, %cst_15 {dimension_numbers = #tpu.dot_dimension_numbers<[1], [0], [0], [1], [0, 0, 1, 1], [], []>} : vector<32x32xf32>, vector<32x32xf32>, vector<32x32xf32> -> vector<32x32xf32>
    %c0_16 = arith.constant 0 : index
    %c0_17 = arith.constant 0 : index
    %16 = vector.load %arg8[%c0_16, %c0_17] : memref<1x32xf32, #tpu.memory_space<vmem>>, vector<1x32xf32>
    %17 = vector.broadcast %16 : vector<1x32xf32> to vector<32x32xf32>
    %18 = arith.addf %15, %17 : vector<32x32xf32>
    %cst_18 = arith.constant 0.000000e+00 : f32
    %19 = vector.broadcast %cst_18 : f32 to vector<32x32xf32>
    %20 = arith.maximumf %18, %19 : vector<32x32xf32>
    %c0_19 = arith.constant 0 : index
    %c0_20 = arith.constant 0 : index
    %21 = vector.load %arg9[%c0_19, %c0_20] : memref<32x8xf32, #tpu.memory_space<vmem>>, vector<32x8xf32>
    %cst_21 = arith.constant dense<0.000000e+00> : vector<32x8xf32>
    %22 = tpu.matmul %20, %21, %cst_21 {dimension_numbers = #tpu.dot_dimension_numbers<[1], [0], [0], [1], [0, 0, 1, 1], [], []>} : vector<32x32xf32>, vector<32x8xf32>, vector<32x8xf32> -> vector<32x8xf32>
    %c0_22 = arith.constant 0 : index
    %c0_23 = arith.constant 0 : index
    %23 = vector.load %arg10[%c0_22, %c0_23] : memref<1x8xf32, #tpu.memory_space<vmem>>, vector<1x8xf32>
    %24 = vector.broadcast %23 : vector<1x8xf32> to vector<32x8xf32>
    %25 = arith.addf %22, %24 : vector<32x8xf32>
    %cst_24 = arith.constant 0.000000e+00 : f32
    %26 = vector.broadcast %cst_24 : f32 to vector<32x8xf32>
    %27 = arith.maximumf %25, %26 : vector<32x8xf32>
    %28 = vector.broadcast %cst_24 : f32 to vector<32x8xf32>
    %29 = arith.subf %25, %28 : vector<32x8xf32>
    %30 = arith.cmpf one, %29, %29 : vector<32x8xf32>
    %31 = vector.broadcast %cst_24 : f32 to vector<32x8xf32>
    %32 = arith.addf %25, %31 : vector<32x8xf32>
    %33 = math.absf %29 : vector<32x8xf32>
    %cst_25 = arith.constant 0.000000e+00 : f32
    %34 = vector.broadcast %cst_25 : f32 to vector<32x8xf32>
    %35 = arith.subf %34, %33 : vector<32x8xf32>
    %36 = math.exp %35 : vector<32x8xf32>
    %37 = math.log1p %36 : vector<32x8xf32>
    %38 = arith.addf %27, %37 : vector<32x8xf32>
    %39 = arith.select %30, %32, %38 : vector<32x8xi1>, vector<32x8xf32>
    %c0_26 = arith.constant 0 : index
    %c0_27 = arith.constant 0 : index
    %c0_28 = arith.constant 0 : index
    %40 = vector.load %arg11[%c0_26, %c0_27, %c0_28] : memref<1x32x8xf32, #tpu.memory_space<vmem>>, vector<1x32x8xf32>
    %41 = vector.shape_cast %40 : vector<1x32x8xf32> to vector<32x8xf32>
    %42 = vector.shape_cast %39 : vector<32x8xf32> to vector<1x32x8xf32>
    tpu.vector_store %arg11[%c0_26, %c0_27, %c0_28], %42 {strides = array<i32>} : memref<1x32x8xf32, #tpu.memory_space<vmem>>, vector<1x32x8xf32>,
    return
  }
  func.func @transform_0(%arg0: i32, %arg1: i32) -> (i32, i32, i32) {
    %c0_i32 = arith.constant 0 : i32
    %c0_i32_0 = arith.constant 0 : i32
    return %arg0, %arg1, %c0_i32 : i32, i32, i32
  }
  func.func @transform_1(%arg0: i32, %arg1: i32) -> (i32, i32, i32) {
    %c0_i32 = arith.constant 0 : i32
    %c0_i32_0 = arith.constant 0 : i32
    %c0_i32_1 = arith.constant 0 : i32
    return %c0_i32, %arg1, %c0_i32_0 : i32, i32, i32
  }
  func.func @transform_2(%arg0: i32, %arg1: i32) -> (i32, i32) {
    %c0_i32 = arith.constant 0 : i32
    %c0_i32_0 = arith.constant 0 : i32
    %c0_i32_1 = arith.constant 0 : i32
    return %c0_i32, %c0_i32_0 : i32, i32
  }
  func.func @transform_3(%arg0: i32, %arg1: i32) -> (i32, i32) {
    %c0_i32 = arith.constant 0 : i32
    %c0_i32_0 = arith.constant 0 : i32
    %c0_i32_1 = arith.constant 0 : i32
    return %c0_i32, %c0_i32_0 : i32, i32
  }
  func.func @transform_4(%arg0: i32, %arg1: i32) -> (i32, i32) {
    %c0_i32 = arith.constant 0 : i32
    %c0_i32_0 = arith.constant 0 : i32
    %c0_i32_1 = arith.constant 0 : i32
    return %c0_i32, %c0_i32_0 : i32, i32
  }
  func.func @transform_5(%arg0: i32, %arg1: i32) -> (i32, i32) {
    %c0_i32 = arith.constant 0 : i32
    %c0_i32_0 = arith.constant 0 : i32
    %c0_i32_1 = arith.constant 0 : i32
    return %c0_i32, %c0_i32_0 : i32, i32
  }
  func.func @transform_6(%arg0: i32, %arg1: i32) -> (i32, i32) {
    %c0_i32 = arith.constant 0 : i32
    %c0_i32_0 = arith.constant 0 : i32
    %c0_i32_1 = arith.constant 0 : i32
    return %c0_i32, %c0_i32_0 : i32, i32
  }
  func.func @transform_7(%arg0: i32, %arg1: i32) -> (i32, i32) {
    %c0_i32 = arith.constant 0 : i32
    %c0_i32_0 = arith.constant 0 : i32
    %c0_i32_1 = arith.constant 0 : i32
    return %c0_i32, %c0_i32_0 : i32, i32
  }
  func.func @transform_8(%arg0: i32, %arg1: i32) -> (i32, i32) {
    %c0_i32 = arith.constant 0 : i32
    %c0_i32_0 = arith.constant 0 : i32
    %c0_i32_1 = arith.constant 0 : i32
    return %c0_i32, %c0_i32_0 : i32, i32
  }
  func.func @transform_9(%arg0: i32, %arg1: i32) -> (i32, i32, i32) {
    %c0_i32 = arith.constant 0 : i32
    %c0_i32_0 = arith.constant 0 : i32
    return %arg0, %arg1, %c0_i32 : i32, i32, i32
  }
}

</mosaic_0001>

<bundles_post_ra>
// kernel: _lambda_.6
= control target key start
LH: loop header
LB: loop body
LE: loop exit
PB: predicated region body
PF: predicated region fallthrough
CT: control target
= control target key end

     0   :  { %8 = vsyncpa [#allocation3], 0  ;;  %s215_s12 = smov [#allocation2]   ;;  %s276_s0 = inlined_call_operand.hbm [shape: f32[1,32,12], index: 0, kind: input, shape index: {}]   ;;  %s277_s1 = inlined_call_operand.vmem [shape: f32[12,32], index: 1, kind: input, shape index: {}]   ;;  %s278_s2 = inlined_call_operand.vmem [shape: f32[1,32], index: 2, kind: input, shape index: {}]   ;;  %s279_s3 = inlined_call_operand.vmem [shape: f32[1,32,32], index: 3, kind: output, shape index: {}]  }
   0x1   :  { %s14_s13 = sshll.u32 %s215_s12, 4  ;;  %s191_s16 = scalar_lea.hbm %s276_s0, 512  ;;  %s15_s13 = int_to_ptr.vmem [resolvable:$true] %s14_s13 }
   0x2   :  { %p192_p0 = scmp.ne.s32.totalorder %s276_s0, %s191_s16  ;;  %p195_p1 = scmp.lt.u32.totalorder %s191_s16, %s276_s0 }
   0x4   :  { %p197_p2 = pnand %p195_p1, %p192_p0 }
   0x6   :  { %200 = shalt.err (!%p197_p2)
}
   0x7   :  { %s201_s21 = scalar_lea.vmem %s15_s13, 512  ;;  %p206_p4 = scmp.lt.s32.totalorder %s15_s13, %s15_s13 }
   0x8   :  { %p202_p3 = scmp.ne.s32.totalorder %s15_s13, %s201_s21  ;;  %p207_p5 = scmp.lt.s32.totalorder %s201_s21, %s201_s21 }
   0xa   :  { %p208_p6 = por %p207_p5, %p206_p4 }
   0xc   :  { %p209_p7 = pnand %p208_p6, %p202_p3 }
   0xe   :  { %212 = shalt.err (!%p209_p7)
}
   0xf   :  { %s216_s22 = smov 128   ;;  %s217_s23 = smov 8  }
  0x10   :  { %20 = dma.hbm_to_vmem [thread:$0]  %s276_s0, 512, %s15_s13, [#allocation3], %s216_s22, %s216_s22, %s217_s23  }
  0x11   :  { %213 = dma.done.wait [#allocation3], 512  }
  0x12   :  { %214 = vsyncadd [#allocation3], 4294966784  ;;  %vm54_vm0 = vcmask 1043456   ;;  %vm41_vm1 = vcmask 97280   ;;  %vm218_vm2 = vmmov 1   ;;  %v32_v0 = vld [vmem:[%s277_s1] sm:$0xff] }
  0x13   :  { %vm180_vm3 = vmpackc.low %vm54_vm0, %vm218_vm2  ;;  %v33_v1 = vld [vmem:[%s277_s1 + $0x8] sm:$0xf]  ;;  %v28_v2 = vld [vmem:[#allocation2] sm:$0xff]  ;;  %vm147_vm4 = vcmask 261120  }
  0x14   :  { %v179_v3 = vpack.c.bf16 %v33_v1, %v32_v0  ;;  %173 = vmatprep.mubr.msk.f32.mxu0 %vm41_vm1, %v28_v2  ;;  %v30_v4 = vld [vmem:[#allocation2 + $0x10] sm:$0xff]  ;;  %v29_v5 = vld [vmem:[#allocation2 + $0x8] sm:$0xff]  ;;  %v31_v6 = vld [vmem:[#allocation2 + $0x18] sm:$0xff] }
  0x15   :  { %176 = vmatprep.mubr.msk.f32.mxu1 %vm41_vm1, %v30_v4  ;;  %v157_v7 = vld [vmem:[%s278_s2] ss:$0 sm:$0xff] }
  0x16   :  { %181 = vmatprep.subr.msk.bf16.mxu0 %vm180_vm3, %v179_v3  ;;  %185 = vmatprep.subr.msk.bf16.mxu1 %vm180_vm3, %v179_v3 }
  0x17   :  { %184 = vmatpush3.bf16.msk.msra.mxu0 %vm180_vm3, %v179_v3  ;;  %186 = vmatpush3.bf16.msk.msra.mxu1 %vm180_vm3, %v179_v3 }
  0x1a   :  { %174 = vmatmul.mubr.msk.f32.vlgmr.msra.gmra.mrb[0].mxu0 %vm41_vm1, %v29_v5  ;;  %177 = vmatmul.mubr.msk.f32.vlgmr.msra.gmra.mrb[0].mxu1 %vm41_vm1, %v31_v6 }
  0xed   :  { %v175_v8 = vpop.f32.mrb[0].mxu0  ;;  %v178_v9 = vpop.f32.mrb[0].mxu1 }
  0xee   :  { %v130_v10 = vadd.f32 %v175_v8, %v157_v7  ;;  %v140_v11 = vadd.f32 %v178_v9, %v157_v7  ;;  %v124_v12 = vpop.f32.mrb[1].mxu0  ;;  %v134_v13 = vpop.f32.mrb[1].mxu1 }
  0xef   :  { %v125_v14 = vadd.f32 %v157_v7, %v124_v12  ;;  %v135_v15 = vadd.f32 %v157_v7, %v134_v13 }
  0xf0   :  { %v144_v16 = vmax.f32 %v130_v10, 0.0  ;;  %v146_v17 = vmax.f32 %v140_v11, 0.0 }
  0xf1   :  { %v143_v18 = vmax.f32 %v125_v14, 0.0  ;;  %v145_v19 = vmax.f32 %v135_v15, 0.0 }
  0xf2   :  { %149 = vst.msk [vmem:[%s279_s3 + $0x8] sm:$0xff] %vm147_vm4, %v144_v16  ;;  %151 = vst.msk [vmem:[%s279_s3 + $0x18] sm:$0xff] %vm147_vm4, %v146_v17 }
  0xf3   :  { %148 = vst.msk [vmem:[%s279_s3] sm:$0xff] %vm147_vm4, %v143_v18  ;;  %150 = vst.msk [vmem:[%s279_s3 + $0x10] sm:$0xff] %vm147_vm4, %v145_v19 }
  0xf4   :  { %156 = vsyncpa [#allocation3], 1 }

// kernel: _lambda_.7
= control target key start
LH: loop header
LB: loop body
LE: loop exit
PB: predicated region body
PF: predicated region fallthrough
CT: control target
= control target key end

     0   :  { %s1009_s24 = smov 0   ;;  %s1011_s25 = smov 0   ;;  %s1135_s0 = inlined_call_operand.vmem [shape: f32[3,32,16], index: 0, kind: input, shape index: {}]   ;;  %s1136_s1 = inlined_call_operand.vmem [shape: f32[16,32], index: 1, kind: input, shape index: {}]   ;;  %s1137_s2 = inlined_call_operand.vmem [shape: f32[1,32], index: 2, kind: input, shape index: {}]   ;;  %s1138_s3 = inlined_call_operand.vmem [shape: f32[1,32,32], index: 3, kind: input, shape index: {}]   ;;  %s1139_s4 = inlined_call_operand.vmem [shape: f32[32,32], index: 4, kind: input, shape index: {}]   ;;  %s1140_s5 = inlined_call_operand.vmem [shape: f32[1,32], index: 5, kind: input, shape index: {}]   ;;  %s1141_s6 = inlined_call_operand.vmem [shape: f32[3,32,32], index: 6, kind: output, shape index: {0}]   ;;  %s1142_s7 = inlined_call_operand.vmem [shape: f32[3,32,32], index: 7, kind: output, shape index: {1}]  }
   0x1   :  { %s1013_s26 = smov 0  }
   0x2 LB: > { %s30_s27 = sadd.s32 1, %s963_s25  ;;  %p833_p0 = scmp.ge.s32.totalorder %s967_s26, 1  ;;  %s967_s26 = sphi %s1013_s26, %s18_s26   ;;  %s963_s25 = sphi %s1011_s25, %s1144_s25   ;;  %s959_s24 = sphi %s1009_s24, %s1143_s24  }
   0x3   : > { %p32_p1 = scmp.ge.s32.totalorder %s30_s27, 3  ;;  %p274_p2 = scmp.lt.s32.totalorder %s967_s26, 4 }
   0x5   : > { %s1146_s27 = smov (%p32_p1, %s30_s27), 0  ;;  %p275_p3 = pnand %p833_p0, %p274_p2 }
   0x6   : > { %v368_v0 = vld [vmem:[%s1136_s1] sm:$0xff] (!%p275_p3)  ;;  %v369_v1 = vld [vmem:[%s1136_s1 + $0x8] sm:$0xff] (!%p275_p3)  ;;  %p329_p4 = scmp.lt.s32.totalorder (!%p275_p3), %s959_s24, 2  ;;  %vm377_vm0 = vcmask (!%p275_p3), 130048   ;;  %v562_v10 = vld [vmem:[%s1139_s4 + $0x10] sm:$0xff] (!%p275_p3)  ;;  %vm547_vm1 = vcmask (!%p275_p3), 261120  }
   0x7   : > { %278 = sbr.rel (%p275_p3) target bundleno = 495 (0x1ef), region = 44  ;;  %v893_v2 = vpack.c.bf16 (!%p275_p3), %v369_v1, %v368_v0  ;;  %v560_v7 = vld [vmem:[%s1139_s4] sm:$0xff] (!%p275_p3)  ;;  %v561_v8 = vld [vmem:[%s1139_s4 + $0x8] sm:$0xff] (!%p275_p3)  ;;  %v563_v11 = vld [vmem:[%s1139_s4 + $0x18] sm:$0xff] (!%p275_p3) }
   0x8   : > { %v897_v9 = vpack.c.bf16 (!%p275_p3), %v561_v8, %v560_v7  ;;  %v901_v12 = vpack.c.bf16 (!%p275_p3), %v563_v11, %v562_v10  ;;  %v840_v13 = vld [vmem:[%s1137_s2] ss:$0 sm:$0xff] (!%p275_p3)  ;;  %v553_v11 = vld [vmem:[%s1138_s3 + $0x8] sm:$0xff] (!%p275_p3) }
   0x9   : > { %894 = vmatprep.subr.bf16.mxu0 (!%p275_p3), %v893_v2  ;;  %v552_v7 = vld [vmem:[%s1138_s3] sm:$0xff] (!%p275_p3) }
   0xa   : > { %896 = vmatpush3.bf16.msra.mxu0 (!%p275_p3), %v893_v2  ;;  %898 = vmatprep.subr.bf16.mxu1 (!%p275_p3), %v897_v9 }
   0xb   : > { %900 = vmatpush3.bf16.msra.mxu1 (!%p275_p3), %v897_v9 }
   0xc   : > { %902 = vmatprep.subr.bf16.mxu1 (!%p275_p3), %v901_v12 }
   0xe   : > { %s1148_s24 = smov (!%p329_p4, %s959_s24), 2 }
   0xf   : > { %s1033_s9 = sshll.u32 %s1148_s24, 5  ;;  %904 = vmatpush3.bf16.msra.mxu1 %v901_v12 }
  0x10   : > { %s336_s12 = scalar_lea.vmem %s1135_s0, %s1033_s9  ;;  %s1074_s28 = scalar_lea.vmem %s1141_s6, %s1033_s9 }
  0x11   : > { %v364_v3 = vld [vmem:[%s336_s12] sm:$0xff]  ;;  %v365_v4 = vld [vmem:[%s336_s12 + $0x8] sm:$0xff]  ;;  %v366_v5 = vld [vmem:[%s336_s12 + $0x10] sm:$0xff]  ;;  %s362_s19 = scalar_lea.vmem %s1142_s7, %s1033_s9 }
  0x12   : > { %873 = vmatprep.mubr.msk.f32.mxu0 %vm377_vm0, %v364_v3  ;;  %v367_v6 = vld [vmem:[%s336_s12 + $0x18] sm:$0xff] }
  0x13   : > { %874 = vmatmul.mubr.msk.f32.vlgmr.msra.gmra.mrb[0].mxu0 %vm377_vm0, %v365_v4 }
  0x14   : > { %876 = vmatprep.mubr.msk.f32.mxu0 %vm377_vm0, %v366_v5 }
  0x17   : > { %877 = vmatmul.mubr.msk.f32.gmra.mrb[2].mxu0 %vm377_vm0, %v367_v6 }
  0xe6   : > { %v875_v14 = vpop.f32.mrb[0].mxu0 }
  0xe7   : > { %v1054_v15 = vadd.f32 %v875_v14, %v840_v13  ;;  %v456_v16 = vpop.f32.mrb[1].mxu0 }
  0xe8   : > { %v1056_v17 = vadd.f32 %v840_v13, %v456_v16 }
  0xe9   : > { %v488_v18 = vand.u32 2147483647, %v1054_v15  ;;  %v476_v51 = vmax.f32 %v1054_v15, 0.0  ;;  %vm480_vm4 = vcmp.ne.f32.partialorder %v1054_v15, %v1054_v15 }
  0xea   : > { %v487_v19 = vand.u32 2147483647, %v1056_v17  ;;  %v878_v20 = vpop.f32.mrb[2].mxu0  ;;  %v475_v61 = vmax.f32 %v1056_v17, 0.0  ;;  %vm479_vm5 = vcmp.ne.f32.partialorder %v1056_v17, %v1056_v17 }
  0xeb   : > { %v492_v21 = vsub.f32 0.0, %v488_v18  ;;  %v1060_v22 = vadd.f32 %v878_v20, %v840_v13  ;;  %v466_v23 = vpop.f32.mrb[3].mxu0 }
  0xec   : > { %v491_v24 = vsub.f32 0.0, %v487_v19  ;;  %v1062_v25 = vadd.f32 %v840_v13, %v466_v23  ;;  %v555_v23 = vld [vmem:[%s1138_s3 + $0x18] sm:$0xff] }
  0xed   : > { %v497_v26 = vmul.f32 1.442695, %v492_v21  ;;  %v490_v27 = vand.u32 2147483647, %v1060_v22  ;;  %v478_v3 = vmax.f32 %v1060_v22, 0.0  ;;  %vm482_vm8 = vcmp.ne.f32.partialorder %v1060_v22, %v1060_v22  ;;  %v554_v21 = vld [vmem:[%s1138_s3 + $0x10] sm:$0xff] }
  0xee   : > { %v495_v28 = vmul.f32 1.442695, %v491_v24  ;;  %v489_v29 = vand.u32 2147483647, %v1062_v25  ;;  %v477_v13 = vmax.f32 %v1062_v25, 0.0  ;;  %vm481_vm9 = vcmp.ne.f32.partialorder %v1062_v25, %v1062_v25 }
  0xef   : > { %929 = vpow2.f32 %v497_v26  ;;  %v494_v30 = vsub.f32 0.0, %v490_v27 }
  0xf0   : > { %931 = vpow2.f32 %v495_v28  ;;  %v493_v31 = vsub.f32 0.0, %v489_v29 }
  0xf1   : > { %v501_v32 = vmul.f32 1.442695, %v494_v30 }
  0xf2   : > { %v499_v33 = vmul.f32 1.442695, %v493_v31 }
  0xf3   : > { %933 = vpow2.f32 %v501_v32 }
  0xf4   : > { %935 = vpow2.f32 %v499_v33 }
  0xf9   : > { %v930_v34 = vpop.eup %929 }
  0xfa   : > { %v932_v35 = vpop.eup %931  ;;  %v512_v36 = vadd.f32 1.0, %v930_v34  ;;  %v515_v41 = vmul.f32 -0.5, %v930_v34  ;;  %v518_v45 = vand.u32 2147483647, %v930_v34 }
  0xfb   : > { %v503_v37 = vadd.f32 1.0, %v932_v35  ;;  %v506_v43 = vmul.f32 -0.5, %v932_v35  ;;  %v509_v49 = vand.u32 2147483647, %v932_v35 }
  0xfc   : > { %937 = vlog2.f32 %v512_v36  ;;  %v516_v44 = vadd.f32 1.0, %v515_v41  ;;  %vm519_vm2 = vcmp.lt.f32.partialorder %v518_v45, 0.0004427343 }
  0xfd   : > { %v934_v38 = vpop.eup %933  ;;  %939 = vlog2.f32 %v503_v37  ;;  %v507_v48 = vadd.f32 1.0, %v506_v43  ;;  %vm510_vm3 = vcmp.lt.f32.partialorder %v509_v49, 0.0004427343 }
  0xfe   : > { %v936_v39 = vpop.eup %935  ;;  %v530_v40 = vadd.f32 1.0, %v934_v38  ;;  %v533_v46 = vmul.f32 -0.5, %v934_v38  ;;  %v517_v54 = vmul.f32 %v930_v34, %v516_v44  ;;  %v536_v56 = vand.u32 2147483647, %v934_v38 }
  0xff   : > { %v521_v42 = vadd.f32 1.0, %v936_v39  ;;  %v524_v47 = vmul.f32 -0.5, %v936_v39  ;;  %v508_v59 = vmul.f32 %v932_v35, %v507_v48  ;;  %v527_v62 = vand.u32 2147483647, %v936_v39 }
 0x100   : > { %941 = vlog2.f32 %v530_v40  ;;  %v534_v55 = vadd.f32 1.0, %v533_v46  ;;  %vm537_vm6 = vcmp.lt.f32.partialorder %v536_v56, 0.0004427343 }
 0x101   : > { %943 = vlog2.f32 %v521_v42  ;;  %v525_v57 = vadd.f32 1.0, %v524_v47  ;;  %vm528_vm7 = vcmp.lt.f32.partialorder %v527_v62, 0.0004427343 }
 0x102   : > { %v535_v5 = vmul.f32 %v934_v38, %v534_v55 }
 0x103   : > { %v526_v9 = vmul.f32 %v936_v39, %v525_v57 }
 0x106   : > { %v938_v50 = vpop.eup %937 }
 0x107   : > { %v940_v52 = vpop.eup %939  ;;  %v514_v53 = vmul.f32 0.6931472, %v938_v50 }
 0x108   : > { %v505_v58 = vmul.f32 0.6931472, %v940_v52 }
 0x109   : > { %v520_v60 = vsel %vm519_vm2, %v517_v54, %v514_v53 }
 0x10a   : > { %v942_v63 = vpop.eup %941  ;;  %v540_v0 = vadd.f32 %v520_v60, %v476_v51  ;;  %v511_v1 = vsel %vm510_vm3, %v508_v59, %v505_v58 }
 0x10b   : > { %v944_v2 = vpop.eup %943  ;;  %v532_v4 = vmul.f32 0.6931472, %v942_v63  ;;  %v539_v6 = vadd.f32 %v511_v1, %v475_v61 }
 0x10c   : > { %v523_v8 = vmul.f32 0.6931472, %v944_v2  ;;  %v544_v10 = vsel %vm480_vm4, %v1054_v15, %v540_v0 }
 0x10d   : > { %v538_v12 = vsel %vm537_vm6, %v535_v5, %v532_v4  ;;  %v543_v14 = vsel %vm479_vm5, %v1056_v17, %v539_v6  ;;  %549 = vst.msk [vmem:[%s1074_s28 + $0x8] sm:$0xff] %vm547_vm1, %v544_v10  ;;  %v557_v20 = vadd.f32 %v553_v11, %v544_v10 }
 0x10e   : > { %v542_v16 = vadd.f32 %v538_v12, %v478_v3  ;;  %v529_v18 = vsel %vm528_vm7, %v526_v9, %v523_v8  ;;  %548 = vst.msk [vmem:[%s1074_s28] sm:$0xff] %vm547_vm1, %v543_v14  ;;  %v556_v15 = vadd.f32 %v552_v7, %v543_v14 }
 0x10f   : > { %v541_v19 = vadd.f32 %v529_v18, %v477_v13 }
 0x110   : > { %887 = vmatprep.mubr.msk.f32.mxu1 %vm547_vm1, %v556_v15  ;;  %v546_v17 = vsel %vm482_vm8, %v1060_v22, %v542_v16  ;;  %v845_v22 = vld [vmem:[%s1140_s5] ss:$0 sm:$0xff] }
 0x111   : > { %888 = vmatmul.mubr.msk.f32.vlgmr.msra.gmra.mrb[0].mxu1 %vm547_vm1, %v557_v20  ;;  %v545_v24 = vsel %vm481_vm9, %v1062_v25, %v541_v19  ;;  %551 = vst.msk [vmem:[%s1074_s28 + $0x18] sm:$0xff] %vm547_vm1, %v546_v17  ;;  %v559_v27 = vadd.f32 %v555_v23, %v546_v17 }
 0x112   : > { %550 = vst.msk [vmem:[%s1074_s28 + $0x10] sm:$0xff] %vm547_vm1, %v545_v24  ;;  %v558_v26 = vadd.f32 %v554_v21, %v545_v24 }
 0x114   : > { %890 = vmatprep.mubr.msk.f32.mxu1 %vm547_vm1, %v558_v26 }
 0x115   : > { %891 = vmatmul.mubr.msk.f32.gmra.mrb[2].mxu1 %vm547_vm1, %v559_v27 }
 0x1e4   : > { %v889_v28 = vpop.f32.mrb[0].mxu1 }
 0x1e5   : > { %v655_v29 = vadd.f32 %v889_v28, %v845_v22  ;;  %v649_v30 = vpop.f32.mrb[1].mxu1 }
 0x1e6   : > { %v650_v25 = vadd.f32 %v845_v22, %v649_v30 }
 0x1e7   : > { %v669_v31 = vmax.f32 %v655_v29, 0.0 }
 0x1e8   : > { %v668_v32 = vmax.f32 %v650_v25, 0.0  ;;  %v892_v33 = vpop.f32.mrb[2].mxu1 }
 0x1e9   : > { %673 = vst.msk [vmem:[%s362_s19 + $0x8] sm:$0xff] %vm547_vm1, %v669_v31  ;;  %v665_v34 = vadd.f32 %v892_v33, %v845_v22  ;;  %v659_v35 = vpop.f32.mrb[3].mxu1 }
 0x1ea   : > { %672 = vst.msk [vmem:[%s362_s19] sm:$0xff] %vm547_vm1, %v668_v32  ;;  %v660_v36 = vadd.f32 %v845_v22, %v659_v35 }
 0x1eb   : > { %v671_v37 = vmax.f32 %v665_v34, 0.0 }
 0x1ec   : > { %v670_v38 = vmax.f32 %v660_v36, 0.0 }
 0x1ed   : > { %675 = vst.msk [vmem:[%s362_s19 + $0x18] sm:$0xff] %vm547_vm1, %v671_v37 }
 0x1ee   : > { %674 = vst.msk [vmem:[%s362_s19 + $0x10] sm:$0xff] %vm547_vm1, %v670_v38 }
 0x1ef PF: > { %s18_s26 = sadd.s32 1, %s967_s26   ;;  %s1143_s24 = smov %s963_s25 }
 0x1f0   : > { %p15_p5 = scmp.ge.s32.totalorder %s18_s26, 5   ;;  %s1144_s25 = smov %s1146_s27 }
 0x1f2   :  { %17 = sbr.rel (!%p15_p5) target bundleno = 2 (0x2), region = 89 }

// kernel: _lambda_.9
= control target key start
LH: loop header
LB: loop body
LE: loop exit
PB: predicated region body
PF: predicated region fallthrough
CT: control target
= control target key end

     0   :  { %13 = vsyncpa [#allocation3], 0  ;;  %s1344_s0 = inlined_call_operand.vmem [shape: f32[3,32,32], index: 0, kind: input, shape index: {}]   ;;  %s1345_s1 = inlined_call_operand.vmem [shape: f32[32,32], index: 1, kind: input, shape index: {}]   ;;  %s1346_s2 = inlined_call_operand.vmem [shape: f32[1,32], index: 2, kind: input, shape index: {}]   ;;  %s1347_s3 = inlined_call_operand.vmem [shape: f32[3,32,32], index: 3, kind: input, shape index: {}]   ;;  %s1348_s4 = inlined_call_operand.vmem [shape: f32[32,32], index: 4, kind: input, shape index: {}]   ;;  %s1349_s5 = inlined_call_operand.vmem [shape: f32[1,32], index: 5, kind: input, shape index: {}]   ;;  %s1350_s6 = inlined_call_operand.hbm [shape: f32[3,32,32], index: 6, kind: output, shape index: {0}]   ;;  %s1351_s7 = inlined_call_operand.vmem [shape: f32[3,32,32], index: 7, kind: output, shape index: {1}]  }
   0x1   :  { %15 = vsyncpa [#allocation3 + $0x1], 0  ;;  %s1131_s24 = smov 0   ;;  %s1133_s25 = smov 0  }
   0x2   :  { %s1135_s26 = smov 0   ;;  %s1137_s27 = smov 0  }
   0x3   :  { %s1139_s28 = smov 0   ;;  %s1141_s29 = smov 0  }
   0x4 LB: > { %s844_s30 = sadd.s32 4294967295, %s1086_s29   ;;  %s845_s8 = sadd.s32 4294967294, %s1086_s29   ;;  %s1086_s29 = sphi %s1141_s29, %s21_s29   ;;  %s1082_s28 = sphi %s1139_s28, %s1358_s28   ;;  %s1078_s27 = sphi %s1137_s27, %s1357_s27   ;;  %s1074_s26 = sphi %s1135_s26, %s1356_s26   ;;  %s1070_s25 = sphi %s1133_s25, %s1355_s25   ;;  %s1066_s24 = sphi %s1131_s24, %s1354_s24  }
   0x5   : > { %s33_s9 = sadd.s32 1, %s1082_s28  ;;  %s182_s10 = sadd.s32 1, %s1074_s26 }
   0x6   : > { %p35_p0 = scmp.ge.s32.totalorder %s33_s9, 3  ;;  %p192_p1 = scmp.ne.s32.totalorder %s1074_s26, %s1070_s25 }
   0x7   : > { %p193_p2 = scmp.eq.s32.totalorder %s844_s30, 2  ;;  %p198_p3 = scmp.ne.s32.totalorder %s1070_s25, %s1066_s24 }
   0x8   : > { %s1360_s9 = smov (%p35_p0, %s33_s9), 0  ;;  %p199_p5 = scmp.eq.s32.totalorder %s845_s8, 2 }
   0x9   : > { %p1171_p4 = por %p193_p2, %p192_p1  ;;  %s177_s12 = ssub.s32 %s1082_s28, %s1360_s9 }
   0xa   : > { %p848_p6 = scmp.ge.s32.totalorder %s1086_s29, 1  ;;  %p180_p7 = scmp.eq.s32.totalorder %s177_s12, 0 }
   0xb   : > { %p1178_p8 = por %p199_p5, %p198_p3  ;;  %p283_p9 = scmp.lt.s32.totalorder %s1086_s29, 4 }
   0xc   : > { %s1184_s14 = scalar_select %p180_p7, %s1074_s26, %s182_s10  }
   0xd   : > { %p284_p10 = pnand %p848_p6, %p283_p9 }
   0xe   : > { %v372_v0 = vld [vmem:[%s1345_s1] sm:$0xff] (!%p284_p10)  ;;  %v373_v1 = vld [vmem:[%s1345_s1 + $0x8] sm:$0xff] (!%p284_p10)  ;;  %v374_v2 = vld [vmem:[%s1345_s1 + $0x10] sm:$0xff] (!%p284_p10)  ;;  %p338_p11 = scmp.lt.s32.totalorder (!%p284_p10), %s1078_s27, 2  ;;  %vm383_vm0 = vcmask (!%p284_p10), 261120   ;;  %s323_s10 = sand.u32 (!%p284_p10), 1, %s1070_s25  }
   0xf   : > { %287 = sbr.rel (%p284_p10) target bundleno = 504 (0x1f8), region = 44  ;;  %v919_v3 = vpack.c.bf16 (!%p284_p10), %v373_v1, %v372_v0  ;;  %v375_v4 = vld [vmem:[%s1345_s1 + $0x18] sm:$0xff] (!%p284_p10)  ;;  %v565_v10 = vld [vmem:[%s1348_s4] sm:$0xff] (!%p284_p10)  ;;  %v566_v11 = vld [vmem:[%s1348_s4 + $0x8] sm:$0xff] (!%p284_p10)  ;;  %s874_s20 = sshll.u32 (!%p284_p10), %s1078_s27, 9 }
  0x10   : > { %v923_v5 = vpack.c.bf16 (!%p284_p10), %v375_v4, %v374_v2  ;;  %v927_v12 = vpack.c.bf16 (!%p284_p10), %v566_v11, %v565_v10  ;;  %v567_v13 = vld [vmem:[%s1348_s4 + $0x10] sm:$0xff] (!%p284_p10)  ;;  %v568_v14 = vld [vmem:[%s1348_s4 + $0x18] sm:$0xff] (!%p284_p10)  ;;  %v856_v16 = vld [vmem:[%s1346_s2] ss:$0 sm:$0xff] (!%p284_p10)  ;;  %s1287_s8 = scalar_lea.sflag (!%p284_p10), [#allocation3], %s323_s10  ;;  %s1088_s15 = smov (!%p284_p10), [#allocation2]  }
  0x11   : > { %920 = vmatprep.subr.bf16.mxu0 (!%p284_p10), %v919_v3  ;;  %v931_v15 = vpack.c.bf16 (!%p284_p10), %v568_v14, %v567_v13  ;;  %s1012_s16 = sshll.u32 (!%p284_p10), %s1088_s15, 4  ;;  %s1013_s16 = int_to_ptr.vmem [resolvable:$false] %s1012_s16 }
  0x12   : > { %922 = vmatpush3.bf16.msra.mxu0 (!%p284_p10), %v919_v3  ;;  %928 = vmatprep.subr.bf16.mxu1 (!%p284_p10), %v927_v12 }
  0x13   : > { %924 = vmatprep.subr.bf16.mxu0 (!%p284_p10), %v923_v5  ;;  %930 = vmatpush3.bf16.msra.mxu1 (!%p284_p10), %v927_v12 }
  0x14   : > { %932 = vmatprep.subr.bf16.mxu1 (!%p284_p10), %v931_v15 }
  0x16   : > { %s339_s23 = scalar_select %p338_p11, %s1078_s27, 2  ;;  %926 = vmatpush3.bf16.msra.mxu0 %v923_v5 }
  0x17   : > { %934 = vmatpush3.bf16.msra.mxu1 %v931_v15 }
  0x18   : > { %s1200_s30 = sshll.u32 %s339_s23, 5  ;;  %s1283_s23 = scalar_lea.hbm %s1350_s6, %s874_s20 }
  0x19   : > { %s345_s12 = scalar_lea.vmem %s1344_s0, %s1200_s30  ;;  %s1245_s17 = scalar_lea.vmem %s1347_s3, %s1200_s30 }
  0x1a   : > { %v368_v6 = vld [vmem:[%s345_s12] sm:$0xff]  ;;  %v369_v7 = vld [vmem:[%s345_s12 + $0x8] sm:$0xff]  ;;  %v370_v8 = vld [vmem:[%s345_s12 + $0x10] sm:$0xff] }
  0x1b   : > { %899 = vmatprep.mubr.msk.f32.mxu0 %vm383_vm0, %v368_v6  ;;  %v371_v9 = vld [vmem:[%s345_s12 + $0x18] sm:$0xff]  ;;  %s849_s12 = sshll.u32 %s323_s10, 5  ;;  %v557_v10 = vld [vmem:[%s1245_s17] sm:$0xff]  ;;  %v558_v14 = vld [vmem:[%s1245_s17 + $0x8] sm:$0xff] }
  0x1c   : > { %900 = vmatmul.mubr.msk.f32.vlgmr.msra.gmra.mrb[0].mxu0 %vm383_vm0, %v369_v7  ;;  %s325_s18 = scalar_lea.vmem [#allocation2], %s849_s12 }
  0x1d   : > { %902 = vmatprep.mubr.msk.f32.mxu0 %vm383_vm0, %v370_v8  ;;  %s706_s19 = sshll.u32 %s325_s18, 4  ;;  %s1277_s19 = int_to_ptr.vmem [resolvable:$true] %s706_s19 }
  0x1e   : > { %s1008_s12 = scalar_lea.vmem %s1277_s19, 512  ;;  %p1015_p1 = scmp.lt.s32.totalorder %s1277_s19, %s1013_s16 }
  0x1f   : > { %p1009_p12 = scmp.ne.s32.totalorder %s1277_s19, %s1008_s12 }
  0x20   : > { %903 = vmatmul.mubr.msk.f32.gmra.mrb[2].mxu0 %vm383_vm0, %v371_v9 }
  0x21   : > { %p1010_p13 = pnand %p1009_p12, %p1171_p4 }
  0x23   : > { %p1011_p0 = pneg %p1010_p13 }
  0xef   : > { %v901_v17 = vpop.f32.mrb[0].mxu0 }
  0xf0   : > { %v1225_v18 = vadd.f32 %v901_v17, %v856_v16  ;;  %v462_v19 = vpop.f32.mrb[1].mxu0 }
  0xf1   : > { %v1227_v20 = vadd.f32 %v856_v16, %v462_v19 }
  0xf2   : > { %v494_v21 = vand.u32 2147483647, %v1225_v18  ;;  %v482_v54 = vmax.f32 %v1225_v18, 0.0  ;;  %vm486_vm3 = vcmp.ne.f32.partialorder %v1225_v18, %v1225_v18 }
  0xf3   : > { %v493_v22 = vand.u32 2147483647, %v1227_v20  ;;  %v904_v23 = vpop.f32.mrb[2].mxu0  ;;  %v481_v0 = vmax.f32 %v1227_v20, 0.0  ;;  %vm485_vm4 = vcmp.ne.f32.partialorder %v1227_v20, %v1227_v20 }
  0xf4   : > { %v498_v24 = vsub.f32 0.0, %v494_v21  ;;  %v1231_v25 = vadd.f32 %v904_v23, %v856_v16  ;;  %v472_v26 = vpop.f32.mrb[3].mxu0 }
  0xf5   : > { %v497_v27 = vsub.f32 0.0, %v493_v22  ;;  %v1233_v28 = vadd.f32 %v856_v16, %v472_v26  ;;  %v560_v26 = vld [vmem:[%s1245_s17 + $0x18] sm:$0xff] }
  0xf6   : > { %v503_v29 = vmul.f32 1.442695, %v498_v24  ;;  %v496_v30 = vand.u32 2147483647, %v1231_v25  ;;  %v484_v6 = vmax.f32 %v1231_v25, 0.0  ;;  %vm488_vm7 = vcmp.ne.f32.partialorder %v1231_v25, %v1231_v25  ;;  %v559_v24 = vld [vmem:[%s1245_s17 + $0x10] sm:$0xff] }
  0xf7   : > { %v501_v31 = vmul.f32 1.442695, %v497_v27  ;;  %v495_v32 = vand.u32 2147483647, %v1233_v28  ;;  %v483_v16 = vmax.f32 %v1233_v28, 0.0  ;;  %vm487_vm8 = vcmp.ne.f32.partialorder %v1233_v28, %v1233_v28  ;;  %s1014_s17 = scalar_lea.vmem %s1013_s16, 1024 }
  0xf8   : > { %992 = vpow2.f32 %v503_v29  ;;  %v500_v33 = vsub.f32 0.0, %v496_v30  ;;  %p1016_p2 = scmp.lt.s32.totalorder %s1014_s17, %s1008_s12 }
  0xf9   : > { %994 = vpow2.f32 %v501_v31  ;;  %v499_v34 = vsub.f32 0.0, %v495_v32 }
  0xfa   : > { %v507_v35 = vmul.f32 1.442695, %v500_v33  ;;  %p1017_p3 = por %p1016_p2, %p1015_p1 }
  0xfb   : > { %v505_v36 = vmul.f32 1.442695, %v499_v34 }
  0xfc   : > { %996 = vpow2.f32 %v507_v35  ;;  %p1018_p5 = pnand %p1017_p3, %p1011_p0 }
  0xfd   : > { %998 = vpow2.f32 %v505_v36 }
 0x102   : > { %v993_v37 = vpop.eup %992 }
 0x103   : > { %v995_v38 = vpop.eup %994  ;;  %v518_v39 = vadd.f32 1.0, %v993_v37  ;;  %v521_v44 = vmul.f32 -0.5, %v993_v37  ;;  %v524_v48 = vand.u32 2147483647, %v993_v37 }
 0x104   : > { %v509_v40 = vadd.f32 1.0, %v995_v38  ;;  %v512_v46 = vmul.f32 -0.5, %v995_v38  ;;  %v515_v52 = vand.u32 2147483647, %v995_v38 }
 0x105   : > { %1000 = vlog2.f32 %v518_v39  ;;  %v522_v47 = vadd.f32 1.0, %v521_v44  ;;  %vm525_vm1 = vcmp.lt.f32.partialorder %v524_v48, 0.0004427343 }
 0x106   : > { %v997_v41 = vpop.eup %996  ;;  %1002 = vlog2.f32 %v509_v40  ;;  %v513_v51 = vadd.f32 1.0, %v512_v46  ;;  %vm516_vm2 = vcmp.lt.f32.partialorder %v515_v52, 0.0004427343 }
 0x107   : > { %v999_v42 = vpop.eup %998  ;;  %v536_v43 = vadd.f32 1.0, %v997_v41  ;;  %v539_v49 = vmul.f32 -0.5, %v997_v41  ;;  %v523_v57 = vmul.f32 %v993_v37, %v522_v47  ;;  %v542_v59 = vand.u32 2147483647, %v997_v41 }
 0x108   : > { %v527_v45 = vadd.f32 1.0, %v999_v42  ;;  %v530_v50 = vmul.f32 -0.5, %v999_v42  ;;  %v514_v62 = vmul.f32 %v995_v38, %v513_v51  ;;  %v533_v1 = vand.u32 2147483647, %v999_v42 }
 0x109   : > { %1004 = vlog2.f32 %v536_v43  ;;  %v540_v58 = vadd.f32 1.0, %v539_v49  ;;  %vm543_vm5 = vcmp.lt.f32.partialorder %v542_v59, 0.0004427343 }
 0x10a   : > { %1006 = vlog2.f32 %v527_v45  ;;  %v531_v60 = vadd.f32 1.0, %v530_v50  ;;  %vm534_vm6 = vcmp.lt.f32.partialorder %v533_v1, 0.0004427343 }
 0x10b   : > { %v541_v8 = vmul.f32 %v997_v41, %v540_v58 }
 0x10c   : > { %v532_v12 = vmul.f32 %v999_v42, %v531_v60 }
 0x10f   : > { %v1001_v53 = vpop.eup %1000 }
 0x110   : > { %v1003_v55 = vpop.eup %1002  ;;  %v520_v56 = vmul.f32 0.6931472, %v1001_v53 }
 0x111   : > { %v511_v61 = vmul.f32 0.6931472, %v1003_v55 }
 0x112   : > { %v526_v63 = vsel %vm525_vm1, %v523_v57, %v520_v56 }
 0x113   : > { %v1005_v2 = vpop.eup %1004  ;;  %v546_v3 = vadd.f32 %v526_v63, %v482_v54  ;;  %v517_v4 = vsel %vm516_vm2, %v514_v62, %v511_v61 }
 0x114   : > { %v1007_v5 = vpop.eup %1006  ;;  %v538_v7 = vmul.f32 0.6931472, %v1005_v2  ;;  %v545_v9 = vadd.f32 %v517_v4, %v481_v0 }
 0x115   : > { %v529_v11 = vmul.f32 0.6931472, %v1007_v5  ;;  %v550_v13 = vsel %vm486_vm3, %v1225_v18, %v546_v3 }
 0x116   : > { %v544_v15 = vsel %vm543_vm5, %v541_v8, %v538_v7  ;;  %v549_v17 = vsel %vm485_vm4, %v1227_v20, %v545_v9  ;;  %554 = vst.msk [vmem:[%s325_s18 + $0x8] sm:$0xff] %vm383_vm0, %v550_v13  ;;  %v562_v23 = vadd.f32 %v558_v14, %v550_v13 }
 0x117   : > { %v548_v19 = vadd.f32 %v544_v15, %v484_v6  ;;  %v535_v21 = vsel %vm534_vm6, %v532_v12, %v529_v11  ;;  %553 = vst.msk [vmem:[%s325_s18] sm:$0xff] %vm383_vm0, %v549_v17  ;;  %v561_v22 = vadd.f32 %v557_v10, %v549_v17 }
 0x118   : > { %v547_v18 = vadd.f32 %v535_v21, %v483_v16 }
 0x119   : > { %913 = vmatprep.mubr.msk.f32.mxu1 %vm383_vm0, %v561_v22  ;;  %v552_v20 = vsel %vm488_vm7, %v1231_v25, %v548_v19 }
 0x11a   : > { %914 = vmatmul.mubr.msk.f32.vlgmr.msra.gmra.mrb[0].mxu1 %vm383_vm0, %v562_v23  ;;  %v551_v27 = vsel %vm487_vm8, %v1233_v28, %v547_v18  ;;  %556 = vst.msk [vmem:[%s325_s18 + $0x18] sm:$0xff] %vm383_vm0, %v552_v20  ;;  %v564_v30 = vadd.f32 %v560_v26, %v552_v20 }
 0x11b   : > { %555 = vst.msk [vmem:[%s325_s18 + $0x10] sm:$0xff] %vm383_vm0, %v551_v27  ;;  %v563_v29 = vadd.f32 %v559_v24, %v551_v27 }
 0x11d   : > { %916 = vmatprep.mubr.msk.f32.mxu1 %vm383_vm0, %v563_v29 }
 0x11e   : > { %917 = vmatmul.mubr.msk.f32.gmra.mrb[2].mxu1 %vm383_vm0, %v564_v30 }
 0x11f   : > { %1021 = shalt.err (!%p1018_p5)
}
 0x120   : > { %s1022_s27 = scalar_lea.hbm %s1283_s23, 512  ;;  %s1026_s20 = scalar_lea.hbm %s1350_s6, 1536 }
 0x121   : > { %p1023_p6 = scmp.ne.s32.totalorder %s1283_s23, %s1022_s27  ;;  %p1027_p10 = scmp.lt.u32.totalorder %s1283_s23, %s1350_s6 }
 0x122   : > { %p1028_p11 = scmp.lt.u32.totalorder %s1026_s20, %s1022_s27  ;;  %p1030_p13 = scmp.lt.u32.totalorder %s1022_s27, %s1283_s23 }
 0x123   : > { %p1024_p7 = pnand %p1023_p6, %p1171_p4 }
 0x124   : > { %p1029_p12 = por %p1028_p11, %p1027_p10 }
 0x125   : > { %p1025_p9 = pneg %p1024_p7 }
 0x126   : > { %p1031_p0 = por %p1030_p13, %p1029_p12 }
 0x128   : > { %p1032_p1 = pnand %p1031_p0, %p1025_p9 }
 0x12a   : > { %1035 = shalt.err (!%p1032_p1)
}
 0x12b   : > { %s1089_s12 = smov 128   ;;  %s1090_s15 = smov 8   ;;  %v861_v25 = vld [vmem:[%s1349_s5] ss:$0 sm:$0xff] }
 0x12c   : > { %935 = dma.vmem_to_hbm [thread:$0]  (%p1171_p4), %s1277_s19, 512, %s1283_s23, %s1287_s8, %s1089_s12, %s1089_s12, %s1090_s15  }
 0x12d   : > { %s366_s18 = scalar_lea.vmem %s1351_s7, %s1200_s30 }
 0x1ed   : > { %v915_v28 = vpop.f32.mrb[0].mxu1 }
 0x1ee   : > { %v660_v31 = vadd.f32 %v915_v28, %v861_v25  ;;  %v654_v32 = vpop.f32.mrb[1].mxu1 }
 0x1ef   : > { %v655_v33 = vadd.f32 %v861_v25, %v654_v32 }
 0x1f0   : > { %v674_v34 = vmax.f32 %v660_v31, 0.0 }
 0x1f1   : > { %v673_v35 = vmax.f32 %v655_v33, 0.0  ;;  %v918_v36 = vpop.f32.mrb[2].mxu1 }
 0x1f2   : > { %678 = vst.msk [vmem:[%s366_s18 + $0x8] sm:$0xff] %vm383_vm0, %v674_v34  ;;  %v670_v37 = vadd.f32 %v918_v36, %v861_v25  ;;  %v664_v38 = vpop.f32.mrb[3].mxu1 }
 0x1f3   : > { %677 = vst.msk [vmem:[%s366_s18] sm:$0xff] %vm383_vm0, %v673_v35  ;;  %v665_v39 = vadd.f32 %v861_v25, %v664_v38 }
 0x1f4   : > { %v676_v40 = vmax.f32 %v670_v37, 0.0 }
 0x1f5   : > { %v675_v41 = vmax.f32 %v665_v39, 0.0 }
 0x1f6   : > { %680 = vst.msk [vmem:[%s366_s18 + $0x18] sm:$0xff] %vm383_vm0, %v676_v40 }
 0x1f7   : > { %679 = vst.msk [vmem:[%s366_s18 + $0x10] sm:$0xff] %vm383_vm0, %v675_v41 }
 0x1f8 PF: > { %p941_p4 = scmp.ge.s32.totalorder %s1086_s29, 2  ;;  %s725_s11 = sand.u32 1, %s1066_s24  }
 0x1f9   : > { %s726_s30 = scalar_lea.sflag [#allocation3], %s725_s11 }
 0x1fa   : > { %p938_p2 = pnand %p941_p4, %p1178_p8 }
 0x1fc   : > { %1061 = dma.done.wait (!%p938_p2), %s726_s30, 512  }
 0x1fd   : > { %1063 = vsyncadd (!%p938_p2), %s726_s30, 4294966784  ;;  %s21_s29 = sadd.s32 1, %s1086_s29   ;;  %s1354_s24 = smov %s1070_s25 }
 0x1fe   : > { %p18_p3 = scmp.ge.s32.totalorder %s21_s29, 5   ;;  %s1355_s25 = smov %s1074_s26 }
 0x1ff   : > { %s1356_s26 = smov %s1184_s14  ;;  %s1357_s27 = smov %s1082_s28 }
 0x200   : > { %s1358_s28 = smov %s1360_s9  ;;  %20 = sbr.rel (!%p18_p3) target bundleno = 4 (0x4), region = 94 }
 0x207   :  { %743 = vsyncpa [#allocation3], 1 }
 0x208   :  { %745 = vsyncpa [#allocation3 + $0x1], 1 }

// kernel: _lambda_.8
= control target key start
LH: loop header
LB: loop body
LE: loop exit
PB: predicated region body
PF: predicated region fallthrough
CT: control target
= control target key end

     0   :  { %s1039_s24 = smov 0   ;;  %s1041_s25 = smov 0   ;;  %s1173_s0 = inlined_call_operand.vmem [shape: f32[3,32,32], index: 0, kind: input, shape index: {}]   ;;  %s1174_s1 = inlined_call_operand.vmem [shape: f32[32,32], index: 1, kind: input, shape index: {}]   ;;  %s1175_s2 = inlined_call_operand.vmem [shape: f32[1,32], index: 2, kind: input, shape index: {}]   ;;  %s1176_s3 = inlined_call_operand.vmem [shape: f32[3,32,32], index: 3, kind: input, shape index: {}]   ;;  %s1177_s4 = inlined_call_operand.vmem [shape: f32[32,32], index: 4, kind: input, shape index: {}]   ;;  %s1178_s5 = inlined_call_operand.vmem [shape: f32[1,32], index: 5, kind: input, shape index: {}]   ;;  %s1179_s6 = inlined_call_operand.vmem [shape: f32[3,32,32], index: 6, kind: output, shape index: {0}]   ;;  %s1180_s7 = inlined_call_operand.vmem [shape: f32[3,32,32], index: 7, kind: output, shape index: {1}]  }
   0x1   :  { %s1043_s26 = smov 0  }
   0x2 LB: > { %s30_s27 = sadd.s32 1, %s993_s25  ;;  %p850_p0 = scmp.ge.s32.totalorder %s997_s26, 1  ;;  %s997_s26 = sphi %s1043_s26, %s18_s26   ;;  %s993_s25 = sphi %s1041_s25, %s1182_s25   ;;  %s989_s24 = sphi %s1039_s24, %s1181_s24  }
   0x3   : > { %p32_p1 = scmp.ge.s32.totalorder %s30_s27, 3  ;;  %p280_p2 = scmp.lt.s32.totalorder %s997_s26, 4 }
   0x5   : > { %s1184_s27 = smov (%p32_p1, %s30_s27), 0  ;;  %p281_p3 = pnand %p850_p0, %p280_p2 }
   0x6   : > { %v382_v0 = vld [vmem:[%s1174_s1] sm:$0xff] (!%p281_p3)  ;;  %v383_v1 = vld [vmem:[%s1174_s1 + $0x8] sm:$0xff] (!%p281_p3)  ;;  %v384_v2 = vld [vmem:[%s1174_s1 + $0x10] sm:$0xff] (!%p281_p3)  ;;  %p339_p4 = scmp.lt.s32.totalorder (!%p281_p3), %s989_s24, 2  ;;  %vm393_vm0 = vcmask (!%p281_p3), 261120  }
   0x7   : > { %284 = sbr.rel (%p281_p3) target bundleno = 495 (0x1ef), region = 44  ;;  %v919_v3 = vpack.c.bf16 (!%p281_p3), %v383_v1, %v382_v0  ;;  %v385_v4 = vld [vmem:[%s1174_s1 + $0x18] sm:$0xff] (!%p281_p3)  ;;  %v575_v10 = vld [vmem:[%s1177_s4] sm:$0xff] (!%p281_p3)  ;;  %v576_v11 = vld [vmem:[%s1177_s4 + $0x8] sm:$0xff] (!%p281_p3) }
   0x8   : > { %v923_v5 = vpack.c.bf16 (!%p281_p3), %v385_v4, %v384_v2  ;;  %v927_v12 = vpack.c.bf16 (!%p281_p3), %v576_v11, %v575_v10  ;;  %v577_v13 = vld [vmem:[%s1177_s4 + $0x10] sm:$0xff] (!%p281_p3)  ;;  %v578_v14 = vld [vmem:[%s1177_s4 + $0x18] sm:$0xff] (!%p281_p3)  ;;  %v859_v16 = vld [vmem:[%s1175_s2] ss:$0 sm:$0xff] (!%p281_p3) }
   0x9   : > { %920 = vmatprep.subr.bf16.mxu0 (!%p281_p3), %v919_v3  ;;  %v931_v15 = vpack.c.bf16 (!%p281_p3), %v578_v14, %v577_v13 }
   0xa   : > { %922 = vmatpush3.bf16.msra.mxu0 (!%p281_p3), %v919_v3  ;;  %928 = vmatprep.subr.bf16.mxu1 (!%p281_p3), %v927_v12 }
   0xb   : > { %924 = vmatprep.subr.bf16.mxu0 (!%p281_p3), %v923_v5  ;;  %930 = vmatpush3.bf16.msra.mxu1 (!%p281_p3), %v927_v12 }
   0xc   : > { %932 = vmatprep.subr.bf16.mxu1 (!%p281_p3), %v931_v15 }
   0xe   : > { %s1186_s24 = smov (!%p339_p4, %s989_s24), 2  ;;  %926 = vmatpush3.bf16.msra.mxu0 %v923_v5 }
   0xf   : > { %s1069_s13 = sshll.u32 %s1186_s24, 5  ;;  %934 = vmatpush3.bf16.msra.mxu1 %v931_v15 }
  0x10   : > { %s346_s16 = scalar_lea.vmem %s1173_s0, %s1069_s13  ;;  %s1111_s9 = scalar_lea.vmem %s1176_s3, %s1069_s13 }
  0x11   : > { %v378_v6 = vld [vmem:[%s346_s16] sm:$0xff]  ;;  %v379_v7 = vld [vmem:[%s346_s16 + $0x8] sm:$0xff]  ;;  %v380_v8 = vld [vmem:[%s346_s16 + $0x10] sm:$0xff]  ;;  %s1120_s12 = scalar_lea.vmem %s1179_s6, %s1069_s13  ;;  %s376_s18 = scalar_lea.vmem %s1180_s7, %s1069_s13 }
  0x12   : > { %899 = vmatprep.mubr.msk.f32.mxu0 %vm393_vm0, %v378_v6  ;;  %v381_v9 = vld [vmem:[%s346_s16 + $0x18] sm:$0xff]  ;;  %v567_v10 = vld [vmem:[%s1111_s9] sm:$0xff]  ;;  %v568_v14 = vld [vmem:[%s1111_s9 + $0x8] sm:$0xff] }
  0x13   : > { %900 = vmatmul.mubr.msk.f32.vlgmr.msra.gmra.mrb[0].mxu0 %vm393_vm0, %v379_v7 }
  0x14   : > { %902 = vmatprep.mubr.msk.f32.mxu0 %vm393_vm0, %v380_v8 }
  0x17   : > { %903 = vmatmul.mubr.msk.f32.gmra.mrb[2].mxu0 %vm393_vm0, %v381_v9 }
  0xe6   : > { %v901_v17 = vpop.f32.mrb[0].mxu0 }
  0xe7   : > { %v1094_v18 = vadd.f32 %v901_v17, %v859_v16  ;;  %v472_v19 = vpop.f32.mrb[1].mxu0 }
  0xe8   : > { %v1096_v20 = vadd.f32 %v859_v16, %v472_v19 }
  0xe9   : > { %v504_v21 = vand.u32 2147483647, %v1094_v18  ;;  %v492_v54 = vmax.f32 %v1094_v18, 0.0  ;;  %vm496_vm3 = vcmp.ne.f32.partialorder %v1094_v18, %v1094_v18 }
  0xea   : > { %v503_v22 = vand.u32 2147483647, %v1096_v20  ;;  %v904_v23 = vpop.f32.mrb[2].mxu0  ;;  %v491_v0 = vmax.f32 %v1096_v20, 0.0  ;;  %vm495_vm4 = vcmp.ne.f32.partialorder %v1096_v20, %v1096_v20 }
  0xeb   : > { %v508_v24 = vsub.f32 0.0, %v504_v21  ;;  %v1100_v25 = vadd.f32 %v904_v23, %v859_v16  ;;  %v482_v26 = vpop.f32.mrb[3].mxu0 }
  0xec   : > { %v507_v27 = vsub.f32 0.0, %v503_v22  ;;  %v1102_v28 = vadd.f32 %v859_v16, %v482_v26  ;;  %v570_v26 = vld [vmem:[%s1111_s9 + $0x18] sm:$0xff] }
  0xed   : > { %v513_v29 = vmul.f32 1.442695, %v508_v24  ;;  %v506_v30 = vand.u32 2147483647, %v1100_v25  ;;  %v494_v6 = vmax.f32 %v1100_v25, 0.0  ;;  %vm498_vm7 = vcmp.ne.f32.partialorder %v1100_v25, %v1100_v25  ;;  %v569_v24 = vld [vmem:[%s1111_s9 + $0x10] sm:$0xff] }
  0xee   : > { %v511_v31 = vmul.f32 1.442695, %v507_v27  ;;  %v505_v32 = vand.u32 2147483647, %v1102_v28  ;;  %v493_v16 = vmax.f32 %v1102_v28, 0.0  ;;  %vm497_vm8 = vcmp.ne.f32.partialorder %v1102_v28, %v1102_v28 }
  0xef   : > { %959 = vpow2.f32 %v513_v29  ;;  %v510_v33 = vsub.f32 0.0, %v506_v30 }
  0xf0   : > { %961 = vpow2.f32 %v511_v31  ;;  %v509_v34 = vsub.f32 0.0, %v505_v32  ;;  %v864_v31 = vld [vmem:[%s1178_s5] ss:$0 sm:$0xff] }
  0xf1   : > { %v517_v35 = vmul.f32 1.442695, %v510_v33 }
  0xf2   : > { %v515_v36 = vmul.f32 1.442695, %v509_v34 }
  0xf3   : > { %963 = vpow2.f32 %v517_v35 }
  0xf4   : > { %965 = vpow2.f32 %v515_v36 }
  0xf9   : > { %v960_v37 = vpop.eup %959 }
  0xfa   : > { %v962_v38 = vpop.eup %961  ;;  %v528_v39 = vadd.f32 1.0, %v960_v37  ;;  %v531_v44 = vmul.f32 -0.5, %v960_v37  ;;  %v534_v48 = vand.u32 2147483647, %v960_v37 }
  0xfb   : > { %v519_v40 = vadd.f32 1.0, %v962_v38  ;;  %v522_v46 = vmul.f32 -0.5, %v962_v38  ;;  %v525_v52 = vand.u32 2147483647, %v962_v38 }
  0xfc   : > { %967 = vlog2.f32 %v528_v39  ;;  %v532_v47 = vadd.f32 1.0, %v531_v44  ;;  %vm535_vm1 = vcmp.lt.f32.partialorder %v534_v48, 0.0004427343 }
  0xfd   : > { %v964_v41 = vpop.eup %963  ;;  %969 = vlog2.f32 %v519_v40  ;;  %v523_v51 = vadd.f32 1.0, %v522_v46  ;;  %vm526_vm2 = vcmp.lt.f32.partialorder %v525_v52, 0.0004427343 }
  0xfe   : > { %v966_v42 = vpop.eup %965  ;;  %v546_v43 = vadd.f32 1.0, %v964_v41  ;;  %v549_v49 = vmul.f32 -0.5, %v964_v41  ;;  %v533_v57 = vmul.f32 %v960_v37, %v532_v47  ;;  %v552_v59 = vand.u32 2147483647, %v964_v41 }
  0xff   : > { %v537_v45 = vadd.f32 1.0, %v966_v42  ;;  %v540_v50 = vmul.f32 -0.5, %v966_v42  ;;  %v524_v62 = vmul.f32 %v962_v38, %v523_v51  ;;  %v543_v1 = vand.u32 2147483647, %v966_v42 }
 0x100   : > { %971 = vlog2.f32 %v546_v43  ;;  %v550_v58 = vadd.f32 1.0, %v549_v49  ;;  %vm553_vm5 = vcmp.lt.f32.partialorder %v552_v59, 0.0004427343 }
 0x101   : > { %973 = vlog2.f32 %v537_v45  ;;  %v541_v60 = vadd.f32 1.0, %v540_v50  ;;  %vm544_vm6 = vcmp.lt.f32.partialorder %v543_v1, 0.0004427343 }
 0x102   : > { %v551_v8 = vmul.f32 %v964_v41, %v550_v58 }
 0x103   : > { %v542_v12 = vmul.f32 %v966_v42, %v541_v60 }
 0x106   : > { %v968_v53 = vpop.eup %967 }
 0x107   : > { %v970_v55 = vpop.eup %969  ;;  %v530_v56 = vmul.f32 0.6931472, %v968_v53 }
 0x108   : > { %v521_v61 = vmul.f32 0.6931472, %v970_v55 }
 0x109   : > { %v536_v63 = vsel %vm535_vm1, %v533_v57, %v530_v56 }
 0x10a   : > { %v972_v2 = vpop.eup %971  ;;  %v556_v3 = vadd.f32 %v536_v63, %v492_v54  ;;  %v527_v4 = vsel %vm526_vm2, %v524_v62, %v521_v61 }
 0x10b   : > { %v974_v5 = vpop.eup %973  ;;  %v548_v7 = vmul.f32 0.6931472, %v972_v2  ;;  %v555_v9 = vadd.f32 %v527_v4, %v491_v0 }
 0x10c   : > { %v539_v11 = vmul.f32 0.6931472, %v974_v5  ;;  %v560_v13 = vsel %vm496_vm3, %v1094_v18, %v556_v3 }
 0x10d   : > { %v554_v15 = vsel %vm553_vm5, %v551_v8, %v548_v7  ;;  %v559_v17 = vsel %vm495_vm4, %v1096_v20, %v555_v9  ;;  %564 = vst.msk [vmem:[%s1120_s12 + $0x8] sm:$0xff] %vm393_vm0, %v560_v13  ;;  %v572_v23 = vadd.f32 %v568_v14, %v560_v13 }
 0x10e   : > { %v558_v19 = vadd.f32 %v554_v15, %v494_v6  ;;  %v545_v21 = vsel %vm544_vm6, %v542_v12, %v539_v11  ;;  %563 = vst.msk [vmem:[%s1120_s12] sm:$0xff] %vm393_vm0, %v559_v17  ;;  %v571_v18 = vadd.f32 %v567_v10, %v559_v17 }
 0x10f   : > { %v557_v22 = vadd.f32 %v545_v21, %v493_v16 }
 0x110   : > { %913 = vmatprep.mubr.msk.f32.mxu1 %vm393_vm0, %v571_v18  ;;  %v562_v20 = vsel %vm498_vm7, %v1100_v25, %v558_v19 }
 0x111   : > { %914 = vmatmul.mubr.msk.f32.vlgmr.msra.gmra.mrb[0].mxu1 %vm393_vm0, %v572_v23  ;;  %v561_v27 = vsel %vm497_vm8, %v1102_v28, %v557_v22  ;;  %566 = vst.msk [vmem:[%s1120_s12 + $0x18] sm:$0xff] %vm393_vm0, %v562_v20  ;;  %v574_v30 = vadd.f32 %v570_v26, %v562_v20 }
 0x112   : > { %565 = vst.msk [vmem:[%s1120_s12 + $0x10] sm:$0xff] %vm393_vm0, %v561_v27  ;;  %v573_v29 = vadd.f32 %v569_v24, %v561_v27 }
 0x114   : > { %916 = vmatprep.mubr.msk.f32.mxu1 %vm393_vm0, %v573_v29 }
 0x115   : > { %917 = vmatmul.mubr.msk.f32.gmra.mrb[2].mxu1 %vm393_vm0, %v574_v30 }
 0x1e4   : > { %v915_v25 = vpop.f32.mrb[0].mxu1 }
 0x1e5   : > { %v670_v32 = vadd.f32 %v915_v25, %v864_v31  ;;  %v664_v33 = vpop.f32.mrb[1].mxu1 }
 0x1e6   : > { %v665_v28 = vadd.f32 %v864_v31, %v664_v33 }
 0x1e7   : > { %v684_v34 = vmax.f32 %v670_v32, 0.0 }
 0x1e8   : > { %v683_v35 = vmax.f32 %v665_v28, 0.0  ;;  %v918_v36 = vpop.f32.mrb[2].mxu1 }
 0x1e9   : > { %688 = vst.msk [vmem:[%s376_s18 + $0x8] sm:$0xff] %vm393_vm0, %v684_v34  ;;  %v680_v37 = vadd.f32 %v918_v36, %v864_v31  ;;  %v674_v38 = vpop.f32.mrb[3].mxu1 }
 0x1ea   : > { %687 = vst.msk [vmem:[%s376_s18] sm:$0xff] %vm393_vm0, %v683_v35  ;;  %v675_v39 = vadd.f32 %v864_v31, %v674_v38 }
 0x1eb   : > { %v686_v40 = vmax.f32 %v680_v37, 0.0 }
 0x1ec   : > { %v685_v41 = vmax.f32 %v675_v39, 0.0 }
 0x1ed   : > { %690 = vst.msk [vmem:[%s376_s18 + $0x18] sm:$0xff] %vm393_vm0, %v686_v40 }
 0x1ee   : > { %689 = vst.msk [vmem:[%s376_s18 + $0x10] sm:$0xff] %vm393_vm0, %v685_v41 }
 0x1ef PF: > { %s18_s26 = sadd.s32 1, %s997_s26   ;;  %s1181_s24 = smov %s993_s25 }
 0x1f0   : > { %p15_p5 = scmp.ge.s32.totalorder %s18_s26, 5   ;;  %s1182_s25 = smov %s1184_s27 }
 0x1f2   :  { %17 = sbr.rel (!%p15_p5) target bundleno = 2 (0x2), region = 89 }

// kernel: _lambda_.10
= control target key start
LH: loop header
LB: loop body
LE: loop exit
PB: predicated region body
PF: predicated region fallthrough
CT: control target
= control target key end

     0   :  { %s544_s12 = smov 0   ;;  %s546_s13 = smov 0   ;;  %s619_s0 = inlined_call_operand.vmem [shape: f32[3,32,32], index: 0, kind: input, shape index: {}]   ;;  %s620_s1 = inlined_call_operand.vmem [shape: f32[32,32], index: 1, kind: input, shape index: {}]   ;;  %s621_s2 = inlined_call_operand.vmem [shape: f32[1,32], index: 2, kind: input, shape index: {}]   ;;  %s622_s3 = inlined_call_operand.vmem [shape: f32[1,32,32], index: 3, kind: output, shape index: {}]  }
   0x1   :  { %s548_s14 = smov 0  }
   0x2 LB: > { %s22_s15 = sadd.s32 1, %s517_s13  ;;  %p425_p0 = scmp.ge.s32.totalorder %s521_s14, 1  ;;  %s521_s14 = sphi %s548_s14, %s13_s14   ;;  %s517_s13 = sphi %s546_s13, %s624_s13   ;;  %s513_s12 = sphi %s544_s12, %s623_s12  }
   0x3   : > { %p23_p1 = scmp.ge.s32.totalorder %s22_s15, 3  ;;  %p156_p2 = scmp.lt.s32.totalorder %s521_s14, 4 }
   0x5   : > { %s626_s15 = smov (%p23_p1, %s22_s15), 0  ;;  %p157_p3 = pnand %p425_p0, %p156_p2 }
   0x6   : > { %p185_p4 = scmp.lt.s32.totalorder (!%p157_p3), %s513_s12, 2  ;;  %p428_p5 = scmp.ne.s32.totalorder (!%p157_p3), %s513_s12, 0 }
   0x7   : > { %160 = sbr.rel (%p157_p3) target bundleno = 256 (0x100), region = 32 }
   0xe   : > { %s186_s16 = scalar_select %p185_p4, %s513_s12, 2 }
   0xf   : > { %203 = sbr.rel (%p428_p5) target bundleno = 22 (0x16), region = 36  ;;  %vm204_vm0 = vcmask (!%p428_p5), 261120   ;;  %v523_v0 = vmov (!%p428_p5), 0.0  }
  0x10   : > { %s439_s17 = sshll.u32 %s186_s16, 5  ;;  %205 = vst.msk [vmem:[#allocation2] sm:$0xff] (!%p428_p5), %vm204_vm0, %v523_v0  ;;  %206 = vst.msk [vmem:[#allocation2 + $0x8] sm:$0xff] (!%p428_p5), %vm204_vm0, %v523_v0 }
  0x11   : > { %s192_s20 = scalar_lea.vmem %s619_s0, %s439_s17  ;;  %207 = vst.msk [vmem:[#allocation2 + $0x10] sm:$0xff] (!%p428_p5), %vm204_vm0, %v523_v0  ;;  %208 = vst.msk [vmem:[#allocation2 + $0x18] sm:$0xff] (!%p428_p5), %vm204_vm0, %v523_v0 }
  0x16 PF: > { %v213_v2 = vld [vmem:[%s192_s20] sm:$0xff]  ;;  %vm221_vm1 = vcmask 261120   ;;  %v214_v5 = vld [vmem:[%s192_s20 + $0x8] sm:$0xff]  ;;  %v215_v7 = vld [vmem:[%s192_s20 + $0x10] sm:$0xff]  ;;  %p429_p6 = scmp.ne.s32.totalorder %s513_s12, 2 }
  0x17   : > { %v209_v1 = vld [vmem:[#allocation2] sm:$0xff]  ;;  %v210_v3 = vld [vmem:[#allocation2 + $0x8] sm:$0xff]  ;;  %v216_v11 = vld [vmem:[%s192_s20 + $0x18] sm:$0xff] }
  0x18   : > { %v217_v4 = vadd.f32 %v213_v2, %v209_v1  ;;  %v211_v6 = vld [vmem:[#allocation2 + $0x10] sm:$0xff]  ;;  %v218_v8 = vadd.f32 %v214_v5, %v210_v3  ;;  %v212_v10 = vld [vmem:[#allocation2 + $0x18] sm:$0xff]  ;;  %229 = sbr.rel (%p429_p6) target bundleno = 256 (0x100), region = 40  ;;  %v238_v13 = vld [vmem:[%s620_s1] sm:$0xff] (!%p429_p6) }
  0x19   : > { %v219_v9 = vadd.f32 %v215_v7, %v211_v6  ;;  %v220_v12 = vadd.f32 %v216_v11, %v212_v10  ;;  %v239_v14 = vld [vmem:[%s620_s1 + $0x8] sm:$0xff] (!%p429_p6)  ;;  %v240_v15 = vld [vmem:[%s620_s1 + $0x10] sm:$0xff] (!%p429_p6)  ;;  %v241_v17 = vld [vmem:[%s620_s1 + $0x18] sm:$0xff] (!%p429_p6) }
  0x1a   : > { %222 = vst.msk [vmem:[#allocation2] sm:$0xff] %vm221_vm1, %v217_v4  ;;  %223 = vst.msk [vmem:[#allocation2 + $0x8] sm:$0xff] %vm221_vm1, %v218_v8  ;;  %v462_v16 = vpack.c.bf16 (!%p429_p6), %v239_v14, %v238_v13  ;;  %v466_v20 = vpack.c.bf16 (!%p429_p6), %v241_v17, %v240_v15  ;;  %v430_v27 = vld [vmem:[%s621_s2] ss:$0 sm:$0xff] (!%p429_p6) }
  0x1b   : > { %224 = vst.msk [vmem:[#allocation2 + $0x10] sm:$0xff] %vm221_vm1, %v219_v9  ;;  %225 = vst.msk [vmem:[#allocation2 + $0x18] sm:$0xff] %vm221_vm1, %v220_v12 }
  0x1c   : > { %463 = vmatprep.subr.bf16.mxu0 (!%p429_p6), %v462_v16  ;;  %470 = vmatprep.subr.bf16.mxu1 (!%p429_p6), %v462_v16 }
  0x1d   : > { %465 = vmatpush3.bf16.msra.mxu0 (!%p429_p6), %v462_v16  ;;  %472 = vmatpush3.bf16.msra.mxu1 (!%p429_p6), %v462_v16 }
  0x1e   : > { %467 = vmatprep.subr.bf16.mxu0 (!%p429_p6), %v466_v20  ;;  %471 = vmatprep.subr.bf16.mxu1 (!%p429_p6), %v466_v20 }
  0x21   : > { %v230_v18 = vld [vmem:[#allocation2] sm:$0xff]  ;;  %v231_v23 = vld [vmem:[#allocation2 + $0x8] sm:$0xff]  ;;  %469 = vmatpush3.bf16.msra.mxu0 %v466_v20  ;;  %473 = vmatpush3.bf16.msra.mxu1 %v466_v20 }
  0x22   : > { %v232_v19 = vld [vmem:[#allocation2 + $0x10] sm:$0xff]  ;;  %v234_v21 = vmul.f32 0.33333334, %v230_v18  ;;  %v233_v24 = vld [vmem:[#allocation2 + $0x18] sm:$0xff]  ;;  %v235_v25 = vmul.f32 0.33333334, %v231_v23 }
  0x23   : > { %v236_v22 = vmul.f32 0.33333334, %v232_v19  ;;  %v237_v26 = vmul.f32 0.33333334, %v233_v24 }
  0x24   : > { %456 = vmatprep.mubr.msk.f32.mxu0 %vm221_vm1, %v234_v21 }
  0x25   : > { %459 = vmatprep.mubr.msk.f32.mxu1 %vm221_vm1, %v236_v22  ;;  %457 = vmatmul.mubr.msk.f32.vlgmr.msra.gmra.mrb[0].mxu0 %vm221_vm1, %v235_v25 }
  0x26   : > { %460 = vmatmul.mubr.msk.f32.vlgmr.msra.gmra.mrb[0].mxu1 %vm221_vm1, %v237_v26 }
  0xf8   : > { %v458_v28 = vpop.f32.mrb[0].mxu0 }
  0xf9   : > { %v461_v29 = vpop.f32.mrb[0].mxu1  ;;  %v333_v30 = vadd.f32 %v458_v28, %v430_v27  ;;  %v327_v32 = vpop.f32.mrb[1].mxu0 }
  0xfa   : > { %v343_v31 = vadd.f32 %v461_v29, %v430_v27  ;;  %v337_v33 = vpop.f32.mrb[1].mxu1  ;;  %v328_v34 = vadd.f32 %v430_v27, %v327_v32 }
  0xfb   : > { %v338_v35 = vadd.f32 %v430_v27, %v337_v33  ;;  %v347_v36 = vmax.f32 %v333_v30, 0.0 }
  0xfc   : > { %v349_v37 = vmax.f32 %v343_v31, 0.0  ;;  %v346_v38 = vmax.f32 %v328_v34, 0.0 }
  0xfd   : > { %v348_v39 = vmax.f32 %v338_v35, 0.0  ;;  %351 = vst.msk [vmem:[%s622_s3 + $0x8] sm:$0xff] %vm221_vm1, %v347_v36 }
  0xfe   : > { %353 = vst.msk [vmem:[%s622_s3 + $0x18] sm:$0xff] %vm221_vm1, %v349_v37  ;;  %350 = vst.msk [vmem:[%s622_s3] sm:$0xff] %vm221_vm1, %v346_v38 }
  0xff   : > { %352 = vst.msk [vmem:[%s622_s3 + $0x10] sm:$0xff] %vm221_vm1, %v348_v39 }
 0x100 PF: > { %s13_s14 = sadd.s32 1, %s521_s14   ;;  %s623_s12 = smov %s517_s13 }
 0x101   : > { %p10_p7 = scmp.ge.s32.totalorder %s13_s14, 5   ;;  %s624_s13 = smov %s626_s15 }
 0x103   :  { %12 = sbr.rel (!%p10_p7) target bundleno = 2 (0x2), region = 70 }

// kernel: _lambda_.11
= control target key start
LH: loop header
LB: loop body
LE: loop exit
PB: predicated region body
PF: predicated region fallthrough
CT: control target
= control target key end

     0   :  { %vm60_vm0 = vcmask 1043456   ;;  %vm755_vm1 = vmmov 1   ;;  %vm47_vm3 = vcmask 97280   ;;  %s944_s0 = inlined_call_operand.vmem [shape: f32[1,32,32], index: 0, kind: input, shape index: {}]   ;;  %s945_s1 = inlined_call_operand.vmem [shape: f32[1,32,12], index: 1, kind: input, shape index: {}]   ;;  %s946_s2 = inlined_call_operand.vmem [shape: f32[32,32], index: 2, kind: input, shape index: {}]   ;;  %s947_s3 = inlined_call_operand.vmem [shape: f32[12,32], index: 3, kind: input, shape index: {}]   ;;  %s948_s4 = inlined_call_operand.vmem [shape: f32[1,32], index: 4, kind: input, shape index: {}]   ;;  %s949_s5 = inlined_call_operand.vmem [shape: f32[32,32], index: 5, kind: input, shape index: {}]   ;;  %s950_s6 = inlined_call_operand.vmem [shape: f32[1,32], index: 6, kind: input, shape index: {}]   ;;  %s951_s7 = inlined_call_operand.vmem [shape: f32[32,8], index: 7, kind: input, shape index: {}]   ;;  %s952_s8 = inlined_call_operand.vmem [shape: f32[1,8], index: 8, kind: input, shape index: {}]   ;;  %s953_s9 = inlined_call_operand.hbm [shape: f32[1,32,8], index: 9, kind: output, shape index: {}]  }
   0x1   :  { %v45_v0 = vld [vmem:[%s947_s3] sm:$0xff]  ;;  %v46_v1 = vld [vmem:[%s947_s3 + $0x8] sm:$0xf]  ;;  %vm678_vm2 = vmpackc.low %vm60_vm0, %vm755_vm1 }
   0x2   :  { %v37_v2 = vld [vmem:[%s945_s1] sm:$0xff]  ;;  %v677_v3 = vpack.c.bf16 %v46_v1, %v45_v0  ;;  %v42_v5 = vld [vmem:[%s946_s2 + $0x8] sm:$0xff]  ;;  %v43_v7 = vld [vmem:[%s946_s2 + $0x10] sm:$0xff] }
   0x3   :  { %v41_v4 = vld [vmem:[%s946_s2] sm:$0xff]  ;;  %629 = vmatprep.mubr.msk.f32.mxu0 %vm47_vm3, %v37_v2  ;;  %v44_v8 = vld [vmem:[%s946_s2 + $0x18] sm:$0xff]  ;;  %v38_v9 = vld [vmem:[%s945_s1 + $0x8] sm:$0xff] }
   0x4   :  { %679 = vmatprep.subr.msk.bf16.mxu0 %vm678_vm2, %v677_v3  ;;  %v683_v6 = vpack.c.bf16 %v42_v5, %v41_v4  ;;  %v39_v10 = vld [vmem:[%s945_s1 + $0x10] sm:$0xff]  ;;  %v687_v11 = vpack.c.bf16 %v44_v8, %v43_v7  ;;  %v262_v12 = vld [vmem:[%s949_s5] sm:$0xff]  ;;  %v263_v13 = vld [vmem:[%s949_s5 + $0x8] sm:$0xff] }
   0x5   :  { %682 = vmatpush3.bf16.msk.msra.mxu0 %vm678_vm2, %v677_v3 }
   0x6   :  { %684 = vmatprep.subr.bf16.mxu0 %v683_v6 }
   0x7   :  { %14 = vsyncpa [#allocation3], 0  ;;  %v691_v14 = vpack.c.bf16 %v263_v13, %v262_v12  ;;  %v40_v15 = vld [vmem:[%s945_s1 + $0x18] sm:$0xff]  ;;  %v33_v16 = vld [vmem:[%s944_s0] sm:$0xff]  ;;  %vm149_vm4 = vcmask 261120   ;;  %vm554_vm5 = vcmask 64512  }
   0x8   :  { %630 = vmatmul.mubr.msk.f32.vlgmr.msra.gmra.mrb[0].mxu0 %vm47_vm3, %v38_v9  ;;  %v34_v17 = vld [vmem:[%s944_s0 + $0x8] sm:$0xff]  ;;  %v35_v18 = vld [vmem:[%s944_s0 + $0x10] sm:$0xff]  ;;  %v36_v19 = vld [vmem:[%s944_s0 + $0x18] sm:$0xff] }
   0x9   :  { %686 = vmatpush3.bf16.msra.mxu0 %v683_v6  ;;  %632 = vmatprep.mubr.msk.f32.mxu0 %vm47_vm3, %v39_v10  ;;  %v264_v20 = vld [vmem:[%s949_s5 + $0x10] sm:$0xff]  ;;  %v265_v21 = vld [vmem:[%s949_s5 + $0x18] sm:$0xff]  ;;  %v374_v23 = vld [vmem:[%s951_s7] sm:$0xff] }
   0xa   :  { %688 = vmatprep.subr.bf16.mxu0 %v687_v11  ;;  %692 = vmatprep.subr.bf16.mxu1 %v691_v14  ;;  %v695_v22 = vpack.c.bf16 %v265_v21, %v264_v20  ;;  %v375_v24 = vld [vmem:[%s951_s7 + $0x8] sm:$0xff]  ;;  %v584_v26 = vld [vmem:[%s948_s4] ss:$0 sm:$0xff]  ;;  %v376_v39 = vld [vmem:[%s951_s7 + $0x10] sm:$0xff] }
   0xb   :  { %694 = vmatpush3.bf16.msra.mxu1 %v691_v14  ;;  %v699_v25 = vpack.c.bf16 %v375_v24, %v374_v23  ;;  %v377_v40 = vld [vmem:[%s951_s7 + $0x18] sm:$0xff]  ;;  %v585_v42 = vld [vmem:[%s950_s6] ss:$0 sm:$0xff] }
   0xc   :  { %633 = vmatmul.mubr.msk.f32.gmra.mrb[2].mxu0 %vm47_vm3, %v40_v15  ;;  %696 = vmatprep.subr.bf16.mxu1 %v695_v22  ;;  %v703_v41 = vpack.c.bf16 %v377_v40, %v376_v39  ;;  %v590_v55 = vld [vmem:[%s952_s8] ss:$0 sm:$0xff]  ;;  %s756_s8 = smov [#allocation2]  }
   0xd   :  { %690 = vmatpush3.bf16.msra.mxu0 %v687_v11  ;;  %643 = vmatprep.mubr.msk.f32.mxu0 %vm149_vm4, %v33_v16  ;;  %s564_s29 = sshll.u32 %s756_s8, 4  ;;  %s565_s29 = int_to_ptr.vmem [resolvable:$true] %s564_s29 }
   0xe   :  { %s731_s2 = scalar_lea.vmem %s565_s29, 512  ;;  %p736_p1 = scmp.lt.s32.totalorder %s565_s29, %s565_s29 }
   0xf   :  { %698 = vmatpush3.bf16.msra.mxu1 %v695_v22  ;;  %p732_p0 = scmp.ne.s32.totalorder %s565_s29, %s731_s2  ;;  %p737_p2 = scmp.lt.s32.totalorder %s731_s2, %s731_s2 }
  0x10   :  { %644 = vmatmul.mubr.msk.f32.vlgmr.msra.gmra.mrb[0].mxu0 %vm149_vm4, %v34_v17  ;;  %700 = vmatprep.subr.bf16.mxu1 %v699_v25 }
  0x11   :  { %646 = vmatprep.mubr.msk.f32.mxu0 %vm149_vm4, %v35_v18  ;;  %p738_p3 = por %p737_p2, %p736_p1 }
  0x13   :  { %p739_p4 = pnand %p738_p3, %p732_p0 }
  0x14   :  { %647 = vmatmul.mubr.msk.f32.gmra.mrb[2].mxu0 %vm149_vm4, %v36_v19 }
  0xe3   :  { %v645_v27 = vpop.f32.mrb[0].mxu0 }
  0xe4   :  { %v255_v28 = vadd.f32 %v645_v27, %v584_v26  ;;  %v228_v29 = vpop.f32.mrb[1].mxu0 }
  0xe5   :  { %v254_v30 = vadd.f32 %v584_v26, %v228_v29 }
  0xe6   :  { %v259_v33 = vmax.f32 %v255_v28, 0.0 }
  0xe7   :  { %v258_v31 = vmax.f32 %v254_v30, 0.0  ;;  %v648_v32 = vpop.f32.mrb[2].mxu0 }
  0xe8   :  { %v257_v34 = vadd.f32 %v648_v32, %v584_v26  ;;  %v238_v35 = vpop.f32.mrb[3].mxu0 }
  0xe9   :  { %v256_v36 = vadd.f32 %v584_v26, %v238_v35  ;;  %657 = vmatprep.mubr.msk.f32.mxu1 %vm149_vm4, %v258_v31 }
  0xea   :  { %658 = vmatmul.mubr.msk.f32.vlgmr.msra.gmra.mrb[0].mxu1 %vm149_vm4, %v259_v33  ;;  %v261_v38 = vmax.f32 %v257_v34, 0.0 }
  0xeb   :  { %v260_v37 = vmax.f32 %v256_v36, 0.0  ;;  %702 = vmatpush3.bf16.msra.mxu1 %v699_v25 }
  0xec   :  { %704 = vmatprep.subr.bf16.mxu1 %v703_v41 }
  0xed   :  { %660 = vmatprep.mubr.msk.f32.mxu1 %vm149_vm4, %v260_v37 }
  0xee   :  { %661 = vmatmul.mubr.msk.f32.gmra.mrb[2].mxu1 %vm149_vm4, %v261_v38 }
  0xef   :  { %706 = vmatpush3.bf16.msra.mxu1 %v703_v41 }
 0x1bd   :  { %v659_v43 = vpop.f32.mrb[0].mxu1 }
 0x1be   :  { %v357_v44 = vadd.f32 %v659_v43, %v585_v42  ;;  %v351_v45 = vpop.f32.mrb[1].mxu1 }
 0x1bf   :  { %v352_v46 = vadd.f32 %v585_v42, %v351_v45 }
 0x1c0   :  { %v371_v49 = vmax.f32 %v357_v44, 0.0 }
 0x1c1   :  { %v370_v47 = vmax.f32 %v352_v46, 0.0  ;;  %v662_v48 = vpop.f32.mrb[2].mxu1 }
 0x1c2   :  { %v367_v50 = vadd.f32 %v662_v48, %v585_v42  ;;  %v361_v51 = vpop.f32.mrb[3].mxu1 }
 0x1c3   :  { %v362_v52 = vadd.f32 %v585_v42, %v361_v51  ;;  %671 = vmatprep.mubr.msk.f32.mxu1 %vm149_vm4, %v370_v47 }
 0x1c4   :  { %672 = vmatmul.mubr.msk.f32.vlgmr.msra.gmra.mrb[4].mxu1 %vm149_vm4, %v371_v49  ;;  %v373_v54 = vmax.f32 %v367_v50, 0.0 }
 0x1c5   :  { %v372_v53 = vmax.f32 %v362_v52, 0.0 }
 0x1c7   :  { %674 = vmatprep.mubr.msk.f32.mxu1 %vm149_vm4, %v372_v53 }
 0x1c8   :  { %675 = vmatmul.mubr.msk.f32.gmra.mrb[6].mxu1 %vm149_vm4, %v373_v54 }
 0x297   :  { %v673_v56 = vpop.f32.mrb[4].mxu1 }
 0x298   :  { %v900_v57 = vadd.f32 %v673_v56, %v590_v55  ;;  %v463_v58 = vpop.f32.mrb[5].mxu1 }
 0x299   :  { %v902_v59 = vadd.f32 %v590_v55, %v463_v58 }
 0x29a   :  { %v495_v60 = vand.u32 2147483647, %v900_v57  ;;  %v483_v29 = vmax.f32 %v900_v57, 0.0  ;;  %vm487_vm8 = vcmp.ne.f32.partialorder %v900_v57, %v900_v57 }
 0x29b   :  { %v494_v61 = vand.u32 2147483647, %v902_v59  ;;  %v676_v62 = vpop.f32.mrb[6].mxu1  ;;  %v482_v39 = vmax.f32 %v902_v59, 0.0  ;;  %vm486_vm9 = vcmp.ne.f32.partialorder %v902_v59, %v902_v59 }
 0x29c   :  { %v499_v63 = vsub.f32 0.0, %v495_v60  ;;  %v906_v0 = vadd.f32 %v676_v62, %v590_v55  ;;  %v473_v1 = vpop.f32.mrb[7].mxu1 }
 0x29d   :  { %v498_v2 = vsub.f32 0.0, %v494_v61  ;;  %v908_v3 = vadd.f32 %v590_v55, %v473_v1 }
 0x29e   :  { %v504_v4 = vmul.f32 1.442695, %v499_v63  ;;  %v497_v5 = vand.u32 2147483647, %v906_v0  ;;  %v485_v46 = vmax.f32 %v906_v0, 0.0  ;;  %vm489_vm12 = vcmp.ne.f32.partialorder %v906_v0, %v906_v0 }
 0x29f   :  { %v502_v6 = vmul.f32 1.442695, %v498_v2  ;;  %v496_v7 = vand.u32 2147483647, %v908_v3  ;;  %v484_v54 = vmax.f32 %v908_v3, 0.0  ;;  %vm488_vm13 = vcmp.ne.f32.partialorder %v908_v3, %v908_v3 }
 0x2a0   :  { %715 = vpow2.f32 %v504_v4  ;;  %v501_v8 = vsub.f32 0.0, %v497_v5 }
 0x2a1   :  { %717 = vpow2.f32 %v502_v6  ;;  %v500_v9 = vsub.f32 0.0, %v496_v7 }
 0x2a2   :  { %v508_v10 = vmul.f32 1.442695, %v501_v8 }
 0x2a3   :  { %v506_v11 = vmul.f32 1.442695, %v500_v9 }
 0x2a4   :  { %719 = vpow2.f32 %v508_v10 }
 0x2a5   :  { %721 = vpow2.f32 %v506_v11 }
 0x2aa   :  { %v716_v12 = vpop.eup %715 }
 0x2ab   :  { %v718_v13 = vpop.eup %717  ;;  %v519_v14 = vadd.f32 1.0, %v716_v12  ;;  %v522_v19 = vmul.f32 -0.5, %v716_v12  ;;  %v525_v23 = vand.u32 2147483647, %v716_v12 }
 0x2ac   :  { %v510_v15 = vadd.f32 1.0, %v718_v13  ;;  %v513_v21 = vmul.f32 -0.5, %v718_v13  ;;  %v516_v27 = vand.u32 2147483647, %v718_v13 }
 0x2ad   :  { %723 = vlog2.f32 %v519_v14  ;;  %v523_v22 = vadd.f32 1.0, %v522_v19  ;;  %vm526_vm6 = vcmp.lt.f32.partialorder %v525_v23, 0.0004427343 }
 0x2ae   :  { %v720_v16 = vpop.eup %719  ;;  %725 = vlog2.f32 %v510_v15  ;;  %v514_v25 = vadd.f32 1.0, %v513_v21  ;;  %vm517_vm7 = vcmp.lt.f32.partialorder %v516_v27, 0.0004427343 }
 0x2af   :  { %v722_v17 = vpop.eup %721  ;;  %v537_v18 = vadd.f32 1.0, %v720_v16  ;;  %v540_v24 = vmul.f32 -0.5, %v720_v16  ;;  %v524_v32 = vmul.f32 %v716_v12, %v523_v22  ;;  %v543_v36 = vand.u32 2147483647, %v720_v16 }
 0x2b0   :  { %v528_v20 = vadd.f32 1.0, %v722_v17  ;;  %v531_v26 = vmul.f32 -0.5, %v722_v17  ;;  %v515_v35 = vmul.f32 %v718_v13, %v514_v25  ;;  %v534_v40 = vand.u32 2147483647, %v722_v17 }
 0x2b1   :  { %727 = vlog2.f32 %v537_v18  ;;  %v541_v33 = vadd.f32 1.0, %v540_v24  ;;  %vm544_vm10 = vcmp.lt.f32.partialorder %v543_v36, 0.0004427343 }
 0x2b2   :  { %729 = vlog2.f32 %v528_v20  ;;  %v532_v37 = vadd.f32 1.0, %v531_v26  ;;  %vm535_vm11 = vcmp.lt.f32.partialorder %v534_v40, 0.0004427343 }
 0x2b3   :  { %v542_v48 = vmul.f32 %v720_v16, %v541_v33 }
 0x2b4   :  { %v533_v51 = vmul.f32 %v722_v17, %v532_v37 }
 0x2b7   :  { %v724_v28 = vpop.eup %723 }
 0x2b8   :  { %v726_v30 = vpop.eup %725  ;;  %v521_v31 = vmul.f32 0.6931472, %v724_v28 }
 0x2b9   :  { %v512_v34 = vmul.f32 0.6931472, %v726_v30 }
 0x2ba   :  { %v527_v38 = vsel %vm526_vm6, %v524_v32, %v521_v31 }
 0x2bb   :  { %v728_v41 = vpop.eup %727  ;;  %v547_v42 = vadd.f32 %v527_v38, %v483_v29  ;;  %v518_v43 = vsel %vm517_vm7, %v515_v35, %v512_v34 }
 0x2bc   :  { %v730_v44 = vpop.eup %729  ;;  %v546_v45 = vadd.f32 %v518_v43, %v482_v39  ;;  %v539_v47 = vmul.f32 0.6931472, %v728_v41 }
 0x2bd   :  { %v551_v49 = vsel %vm487_vm8, %v900_v57, %v547_v42  ;;  %v530_v50 = vmul.f32 0.6931472, %v730_v44 }
 0x2be   :  { %556 = vst.msk [vmem:[#allocation2 + $0x8] sm:$0xff] %vm554_vm5, %v551_v49  ;;  %v550_v52 = vsel %vm486_vm9, %v902_v59, %v546_v45  ;;  %v545_v53 = vsel %vm544_vm10, %v542_v48, %v539_v47 }
 0x2bf   :  { %555 = vst.msk [vmem:[#allocation2] sm:$0xff] %vm554_vm5, %v550_v52  ;;  %v549_v55 = vadd.f32 %v545_v53, %v485_v46  ;;  %v536_v56 = vsel %vm535_vm11, %v533_v51, %v530_v50 }
 0x2c0   :  { %v548_v57 = vadd.f32 %v536_v56, %v484_v54 }
 0x2c1   :  { %v553_v58 = vsel %vm489_vm12, %v906_v0, %v549_v55 }
 0x2c2   :  { %558 = vst.msk [vmem:[#allocation2 + $0x18] sm:$0xff] %vm554_vm5, %v553_v58  ;;  %v552_v59 = vsel %vm488_vm13, %v908_v3, %v548_v57 }
 0x2c3   :  { %557 = vst.msk [vmem:[#allocation2 + $0x10] sm:$0xff] %vm554_vm5, %v552_v59 }
 0x2c4   :  { %742 = shalt.err (!%p739_p4)
}
 0x2c5   :  { %s743_s11 = scalar_lea.hbm %s953_s9, 512 }
 0x2c6   :  { %p744_p5 = scmp.ne.s32.totalorder %s953_s9, %s743_s11  ;;  %p747_p6 = scmp.lt.u32.totalorder %s743_s11, %s953_s9 }
 0x2c8   :  { %p749_p7 = pnand %p747_p6, %p744_p5 }
 0x2ca   :  { %752 = shalt.err (!%p749_p7)
}
 0x2cb   :  { %s757_s1 = smov 128   ;;  %s758_s16 = smov 8  }
 0x2cc   :  { %570 = dma.vmem_to_hbm [thread:$0]  %s565_s29, 512, %s953_s9, [#allocation3], %s757_s1, %s757_s1, %s758_s16  }
 0x2cd   :  { %753 = dma.done.wait [#allocation3], 512  }
 0x2ce   :  { %754 = vsyncadd [#allocation3], 4294966784 }
 0x2cf   :  { %574 = vsyncpa [#allocation3], 1 }

</bundles_post_ra>
